<compile_context>
chip_gen: v7x
topology: tpu7x:2x2x1
jax: 0.10.0
libtpu: 0.0.40
codegen_flags: <defaults>
</compile_context>

<pallas_src>
import functools

import jax
import jax.numpy as jnp
import numpy as np
from jax import lax
from jax.experimental import pallas as pl
from jax.experimental.pallas import tpu as pltpu


def _round_up(x, m):
    return (x + m - 1) // m * m


def _pick_tq(n):
    # Largest aligned query tile that divides N; fall back to a single tile.
    for t in (256, 128):
        if n % t == 0:
            return t
    return n


def _pam_kernel(x_ref, wq_ref, wkv_ref, bq_ref, bkv_ref, gamma_ref,
                out_ref, qT_ref, kv_ref, *, tq, cqp, c):
    qt = pl.program_id(1)

    # --- per-batch prologue: fused projections, cached in VMEM scratch ------
    # x_ref's block index only changes with the batch axis, so it is DMA'd
    # once per batch; this branch runs before any query tile of that batch.
    @pl.when(qt == 0)
    def _():
        xb = x_ref[...].astype(jnp.bfloat16)                              # (C, N)
        q = jnp.dot(wq_ref[...], xb,
                    preferred_element_type=jnp.float32) + bq_ref[...]     # (Cqp, N)
        qT_ref[...] = jnp.transpose(q, (1, 0)).astype(jnp.bfloat16)       # (N, Cqp)
        kv = jnp.dot(wkv_ref[...], xb,
                     preferred_element_type=jnp.float32) + bkv_ref[...]   # (Cqp+C, N)
        kv_ref[...] = kv.astype(jnp.bfloat16)

    # --- per query tile ------------------------------------------------------
    start = pl.multiple_of(qt * tq, tq)
    q_t = qT_ref[pl.ds(start, tq), :]                 # (TQ, Cqp)  bf16
    k = kv_ref[0:cqp, :]                              # (Cqp, N)   bf16
    v = kv_ref[cqp:cqp + c, :]                        # (C,  N)    bf16

    # energy[i, j] = <q_i, k_j>; softmax over j in fp32.
    energy = jnp.dot(q_t, k, preferred_element_type=jnp.float32)          # (TQ, N)
    e_max = jnp.max(energy, axis=-1, keepdims=True)
    p = jnp.exp(energy - e_max)
    denom = jnp.sum(p, axis=-1, keepdims=True)
    attn = (p * pl.reciprocal(denom, approx=True)).astype(jnp.bfloat16)   # (TQ, N)

    # out[ch, i] = sum_j V[ch, j] * attn[i, j]  == bmm(V, A^T) per batch.
    out = lax.dot_general(v, attn, (((1,), (1,)), ((), ())),
                          preferred_element_type=jnp.float32)             # (C, TQ)

    x_tile = x_ref[:, pl.ds(start, tq)]                                    # (C, TQ)
    out_ref[...] = (gamma_ref[0] * out + x_tile).astype(out_ref.dtype)


def pam_module_forward(x_nchw, wq, bq, wk, bk, wv, bv, gamma, *, tq=None):
    """x_nchw: (B, C, H, W) fp32.  Weights follow PyTorch Conv2d 1x1:
    wq/wk: (C//8, C, 1, 1), wv: (C, C, 1, 1), biases 1-D, gamma scalar."""
    B, C, H, W = x_nchw.shape
    N = H * W
    Cq = wq.shape[0]
    Cqp = max(128, _round_up(Cq, 128))        # pad Q/K channels to MXU width
    if tq is None:
        tq = _pick_tq(N)
    assert N % tq == 0, "query tile must divide H*W"

    f32, bf16 = jnp.float32, jnp.bfloat16
    x_bcn = x_nchw.reshape(B, C, N)           # free reshape, no HBM transpose

    # 1x1 conv kernels -> matmul weights in the native (C_out, C_in) layout.
    wq2 = wq.reshape(Cq, C).astype(f32)
    wk2 = wk.reshape(Cq, C).astype(f32)
    wv2 = wv.reshape(C, C).astype(f32)
    pad = ((0, Cqp - Cq), (0, 0))
    wq_m = jnp.pad(wq2, pad).astype(bf16)                                  # (Cqp, C)
    wkv_m = jnp.concatenate([jnp.pad(wk2, pad), wv2], axis=0).astype(bf16)  # (Cqp+C, C)
    bq_m = jnp.pad(bq.astype(f32), (0, Cqp - Cq)).reshape(Cqp, 1)
    bkv_m = jnp.concatenate([jnp.pad(bk.astype(f32), (0, Cqp - Cq)),
                             bv.astype(f32)], axis=0).reshape(Cqp + C, 1)
    gamma_m = jnp.asarray(gamma, f32).reshape(1)

    kernel = functools.partial(_pam_kernel, tq=tq, cqp=Cqp, c=C)

    out_bcn = pl.pallas_call(
        kernel,
        out_shape=jax.ShapeDtypeStruct((B, C, N), x_bcn.dtype),
        grid=(B, N // tq),
        in_specs=[
            pl.BlockSpec((None, C, N), lambda b, q: (b, 0, 0)),   # x: full image/batch
            pl.BlockSpec((Cqp, C), lambda b, q: (0, 0)),          # Wq (padded)
            pl.BlockSpec((Cqp + C, C), lambda b, q: (0, 0)),      # [Wk; Wv]
            pl.BlockSpec((Cqp, 1), lambda b, q: (0, 0)),          # bq (padded)
            pl.BlockSpec((Cqp + C, 1), lambda b, q: (0, 0)),      # [bk; bv]
            pl.BlockSpec(memory_space=pltpu.MemorySpace.SMEM),    # gamma scalar
        ],
        out_specs=pl.BlockSpec((None, C, tq), lambda b, q: (b, 0, q)),
        scratch_shapes=[
            pltpu.VMEM((N, Cqp), bf16),          # Q^T cache (per batch)
            pltpu.VMEM((Cqp + C, N), bf16),      # [K; V] cache (per batch)
        ],
        compiler_params=pltpu.CompilerParams(
            dimension_semantics=("parallel", "arbitrary"),
            # Above the default scoped limit, below v7x's 64 MiB physical VMEM.
            vmem_limit_bytes=56 * 1024 * 1024),
    )(x_bcn, wq_m, wkv_m, bq_m, bkv_m, gamma_m)

    return out_bcn.reshape(B, C, H, W)


def pam_module_reference(x_nchw, wq, bq, wk, bk, wv, bv, gamma):
    """Pure-JAX fp32 reference mirroring the PyTorch forward (for verification)."""
    B, C, H, W = x_nchw.shape
    N = H * W
    Cq = wq.shape[0]
    x_flat = x_nchw.reshape(B, C, N)
    q = jnp.einsum('oc,bcn->bon', wq.reshape(Cq, C), x_flat) + bq[None, :, None]
    k = jnp.einsum('oc,bcn->bon', wk.reshape(Cq, C), x_flat) + bk[None, :, None]
    v = jnp.einsum('oc,bcn->bon', wv.reshape(C, C), x_flat) + bv[None, :, None]
    energy = jnp.einsum('bci,bcj->bij', q, k)                   # (B, N, N)
    attention = jax.nn.softmax(energy, axis=-1)
    out = jnp.einsum('bcj,bij->bci', v, attention)              # (B, C, N)
    return gamma * out.reshape(B, C, H, W) + x_nchw


if __name__ == "__main__":
    B, C, H, W = 2, 128, 16, 16     # C divisible by 8 -> Cq = 16; N = 256
    Cq = C // 8

    key = jax.random.PRNGKey(0)
    kx, kwq, kbq, kwk, kbk, kwv, kbv = jax.random.split(key, 7)

    x = jax.random.normal(kx, (B, C, H, W), dtype=jnp.float32)

    # Deterministic parameter init (shapes per nn.Conv2d 1x1 in __init__).
    bound = 1.0 / np.sqrt(C)
    wq = jax.random.uniform(kwq, (Cq, C, 1, 1), jnp.float32, -bound, bound)
    bq = jax.random.uniform(kbq, (Cq,), jnp.float32, -bound, bound)
    wk = jax.random.uniform(kwk, (Cq, C, 1, 1), jnp.float32, -bound, bound)
    bk = jax.random.uniform(kbk, (Cq,), jnp.float32, -bound, bound)
    wv = jax.random.uniform(kwv, (C, C, 1, 1), jnp.float32, -bound, bound)
    bv = jax.random.uniform(kbv, (C,), jnp.float32, -bound, bound)
    # Module inits gamma to 0; use 0.5 so the attention path is exercised.
    gamma = jnp.float32(0.5)

    # tq=128 forces 2 query tiles so the scratch-reuse / tiled path is tested.
    fwd = jax.jit(functools.partial(pam_module_forward, tq=128))
    out = jax.block_until_ready(fwd(x, wq, bq, wk, bk, wv, bv, gamma))

    ref = pam_module_reference(x, wq, bq, wk, bk, wv, bv, gamma)
    # bf16 MXU inputs (f32 accumulation) + approx reciprocal -> relaxed tolerance.
    np.testing.assert_allclose(np.asarray(out), np.asarray(ref),
                               rtol=2e-2, atol=2e-2)
    print("KERNEL_OK")
</pallas_src>

<mosaic_0001>
module attributes {stable_mosaic.version = 11 : i64} {
  func.func @_pam_kernel(%arg0: i32, %arg1: i32, %arg2: memref<1x128x256xf32, #tpu.memory_space<vmem>>, %arg3: memref<128x128xbf16, #tpu.memory_space<vmem>>, %arg4: memref<256x128xbf16, #tpu.memory_space<vmem>>, %arg5: memref<128x1xf32, #tpu.memory_space<vmem>>, %arg6: memref<256x1xf32, #tpu.memory_space<vmem>>, %arg7: memref<1xf32, #tpu.memory_space<smem>>, %arg8: memref<1x128x128xf32, #tpu.memory_space<vmem>>, %arg9: memref<256x128xbf16, #tpu.memory_space<vmem>>, %arg10: memref<256x256xbf16, #tpu.memory_space<vmem>>) attributes {dimension_semantics = [#tpu.dimension_semantics<parallel>, #tpu.dimension_semantics<arbitrary>], iteration_bounds = array<i64: 2, 2>, scalar_prefetch = 0 : i64, scratch_operands = 2 : i64, tpu.core_type = #tpu.core_type<tc>, window_params = [{transform_indices = @transform_0, window_bounds = array<i64: 1, 128, 256>}, {pipeline_mode = #tpu.pipeline_mode<synchronous>, transform_indices = @transform_1, window_bounds = array<i64: 128, 128>}, {pipeline_mode = #tpu.pipeline_mode<synchronous>, transform_indices = @transform_2, window_bounds = array<i64: 256, 128>}, {pipeline_mode = #tpu.pipeline_mode<synchronous>, transform_indices = @transform_3, window_bounds = array<i64: 128, 1>}, {pipeline_mode = #tpu.pipeline_mode<synchronous>, transform_indices = @transform_4, window_bounds = array<i64: 256, 1>}, {transform_indices = @transform_5, window_bounds = array<i64: 1>}, {transform_indices = @transform_6, window_bounds = array<i64: 1, 128, 128>}]} {
    %c0_i32 = arith.constant 0 : i32
    %0 = arith.cmpi eq, %arg1, %c0_i32 : i32
    %1 = arith.extui %0 : i1 to i32
    %c0_i32_0 = arith.constant 0 : i32
    %2 = arith.cmpi ne, %1, %c0_i32_0 : i32
    scf.if %2 {
      %c0_13 = arith.constant 0 : index
      %c0_14 = arith.constant 0 : index
      %c0_15 = arith.constant 0 : index
      %32 = vector.load %arg2[%c0_13, %c0_14, %c0_15] : memref<1x128x256xf32, #tpu.memory_space<vmem>>, vector<1x128x256xf32>
      %33 = vector.shape_cast %32 : vector<1x128x256xf32> to vector<128x256xf32>
      %34 = arith.truncf %33 : vector<128x256xf32> to vector<128x256xbf16>
      %c0_16 = arith.constant 0 : index
      %c0_17 = arith.constant 0 : index
      %35 = vector.load %arg3[%c0_16, %c0_17] : memref<128x128xbf16, #tpu.memory_space<vmem>>, vector<128x128xbf16>
      %cst_18 = arith.constant dense<0.000000e+00> : vector<128x256xf32>
      %36 = tpu.matmul %35, %34, %cst_18 {dimension_numbers = #tpu.dot_dimension_numbers<[1], [0], [0], [1], [0, 0, 1, 1], [], []>} : vector<128x128xbf16>, vector<128x256xbf16>, vector<128x256xf32> -> vector<128x256xf32>
      %c0_19 = arith.constant 0 : index
      %c0_20 = arith.constant 0 : index
      %37 = vector.load %arg5[%c0_19, %c0_20] : memref<128x1xf32, #tpu.memory_space<vmem>>, vector<128x1xf32>
      %38 = vector.broadcast %37 : vector<128x1xf32> to vector<128x256xf32>
      %39 = arith.addf %36, %38 : vector<128x256xf32>
      %40 = tpu.transpose %39, [1, 0] : vector<128x256xf32> -> vector<256x128xf32>
      %41 = arith.truncf %40 : vector<256x128xf32> to vector<256x128xbf16>
      %c0_21 = arith.constant 0 : index
      %c0_22 = arith.constant 0 : index
      %42 = vector.load %arg9[%c0_21, %c0_22] : memref<256x128xbf16, #tpu.memory_space<vmem>>, vector<256x128xbf16>
      tpu.vector_store %arg9[%c0_21, %c0_22], %41 {strides = array<i32>} : memref<256x128xbf16, #tpu.memory_space<vmem>>, vector<256x128xbf16>,
      %c0_23 = arith.constant 0 : index
      %c0_24 = arith.constant 0 : index
      %43 = vector.load %arg4[%c0_23, %c0_24] : memref<256x128xbf16, #tpu.memory_space<vmem>>, vector<256x128xbf16>
      %cst_25 = arith.constant dense<0.000000e+00> : vector<256x256xf32>
      %44 = tpu.matmul %43, %34, %cst_25 {dimension_numbers = #tpu.dot_dimension_numbers<[1], [0], [0], [1], [0, 0, 1, 1], [], []>} : vector<256x128xbf16>, vector<128x256xbf16>, vector<256x256xf32> -> vector<256x256xf32>
      %c0_26 = arith.constant 0 : index
      %c0_27 = arith.constant 0 : index
      %45 = vector.load %arg6[%c0_26, %c0_27] : memref<256x1xf32, #tpu.memory_space<vmem>>, vector<256x1xf32>
      %46 = vector.broadcast %45 : vector<256x1xf32> to vector<256x256xf32>
      %47 = arith.addf %44, %46 : vector<256x256xf32>
      %48 = arith.truncf %47 : vector<256x256xf32> to vector<256x256xbf16>
      %c0_28 = arith.constant 0 : index
      %c0_29 = arith.constant 0 : index
      %49 = vector.load %arg10[%c0_28, %c0_29] : memref<256x256xbf16, #tpu.memory_space<vmem>>, vector<256x256xbf16>
      tpu.vector_store %arg10[%c0_28, %c0_29], %48 {strides = array<i32>} : memref<256x256xbf16, #tpu.memory_space<vmem>>, vector<256x256xbf16>,
    } else {
    }
    %c128_i32 = arith.constant 128 : i32
    %3 = arith.muli %arg1, %c128_i32 : i32
    %4 = tpu.assume_multiple %3, 128 : i32
    %5 = arith.index_cast %4 : i32 to index
    %c0 = arith.constant 0 : index
    %6 = vector.load %arg9[%5, %c0] : memref<256x128xbf16, #tpu.memory_space<vmem>>, vector<128x128xbf16>
    %c0_1 = arith.constant 0 : index
    %c0_2 = arith.constant 0 : index
    %7 = vector.load %arg10[%c0_1, %c0_2] : memref<256x256xbf16, #tpu.memory_space<vmem>>, vector<128x256xbf16>
    %c128 = arith.constant 128 : index
    %c0_3 = arith.constant 0 : index
    %8 = vector.load %arg10[%c128, %c0_3] : memref<256x256xbf16, #tpu.memory_space<vmem>>, vector<128x256xbf16>
    %cst = arith.constant dense<0.000000e+00> : vector<128x256xf32>
    %9 = tpu.matmul %6, %7, %cst {dimension_numbers = #tpu.dot_dimension_numbers<[1], [0], [0], [1], [0, 0, 1, 1], [], []>} : vector<128x128xbf16>, vector<128x256xbf16>, vector<128x256xf32> -> vector<128x256xf32>
    %cst_4 = arith.constant dense<0xFF800000> : vector<128xf32>
    %10 = vector.multi_reduction <maximumf>, %9, %cst_4 [1] : vector<128x256xf32> to vector<128xf32>
    %11 = vector.shape_cast %10 : vector<128xf32> to vector<128x1xf32>
    %12 = vector.broadcast %11 : vector<128x1xf32> to vector<128x256xf32>
    %13 = arith.subf %9, %12 : vector<128x256xf32>
    %14 = math.exp %13 : vector<128x256xf32>
    %cst_5 = arith.constant dense<0.000000e+00> : vector<128xf32>
    %15 = vector.multi_reduction <add>, %14, %cst_5 [1] : vector<128x256xf32> to vector<128xf32>
    %16 = vector.shape_cast %15 : vector<128xf32> to vector<128x1xf32>
    %17 = tpu.reciprocal %16 {approx = true} : vector<128x1xf32> -> vector<128x1xf32>
    %18 = vector.broadcast %17 : vector<128x1xf32> to vector<128x256xf32>
    %19 = arith.mulf %14, %18 : vector<128x256xf32>
    %20 = arith.truncf %19 : vector<128x256xf32> to vector<128x256xbf16>
    %cst_6 = arith.constant dense<0.000000e+00> : vector<128x128xf32>
    %21 = tpu.matmul %8, %20, %cst_6 {dimension_numbers = #tpu.dot_dimension_numbers<[1], [1], [0], [0], [0, 0, 1, 0], [], []>} : vector<128x256xbf16>, vector<128x256xbf16>, vector<128x128xf32> -> vector<128x128xf32>
    %c0_7 = arith.constant 0 : index
    %c0_8 = arith.constant 0 : index
    %22 = arith.index_cast %4 : i32 to index
    %23 = vector.load %arg2[%c0_7, %c0_8, %22] : memref<1x128x256xf32, #tpu.memory_space<vmem>>, vector<1x128x128xf32>
    %24 = vector.shape_cast %23 : vector<1x128x128xf32> to vector<128x128xf32>
    %c0_9 = arith.constant 0 : index
    %25 = memref.load %arg7[%c0_9] : memref<1xf32, #tpu.memory_space<smem>>
    %26 = vector.broadcast %25 : f32 to vector<128x128xf32>
    %27 = arith.mulf %26, %21 : vector<128x128xf32>
    %28 = arith.addf %27, %24 : vector<128x128xf32>
    %c0_10 = arith.constant 0 : index
    %c0_11 = arith.constant 0 : index
    %c0_12 = arith.constant 0 : index
    %29 = vector.load %arg8[%c0_10, %c0_11, %c0_12] : memref<1x128x128xf32, #tpu.memory_space<vmem>>, vector<1x128x128xf32>
    %30 = vector.shape_cast %29 : vector<1x128x128xf32> to vector<128x128xf32>
    %31 = vector.shape_cast %28 : vector<128x128xf32> to vector<1x128x128xf32>
    tpu.vector_store %arg8[%c0_10, %c0_11, %c0_12], %31 {strides = array<i32>} : memref<1x128x128xf32, #tpu.memory_space<vmem>>, vector<1x128x128xf32>,
    return
  }
  func.func @transform_0(%arg0: i32, %arg1: i32) -> (i32, i32, i32) {
    %c0_i32 = arith.constant 0 : i32
    %c0_i32_0 = arith.constant 0 : i32
    %c0_i32_1 = arith.constant 0 : i32
    return %arg0, %c0_i32, %c0_i32_0 : i32, i32, i32
  }
  func.func @transform_1(%arg0: i32, %arg1: i32) -> (i32, i32) {
    %c0_i32 = arith.constant 0 : i32
    %c0_i32_0 = arith.constant 0 : i32
    %c0_i32_1 = arith.constant 0 : i32
    return %c0_i32, %c0_i32_0 : i32, i32
  }
  func.func @transform_2(%arg0: i32, %arg1: i32) -> (i32, i32) {
    %c0_i32 = arith.constant 0 : i32
    %c0_i32_0 = arith.constant 0 : i32
    %c0_i32_1 = arith.constant 0 : i32
    return %c0_i32, %c0_i32_0 : i32, i32
  }
  func.func @transform_3(%arg0: i32, %arg1: i32) -> (i32, i32) {
    %c0_i32 = arith.constant 0 : i32
    %c0_i32_0 = arith.constant 0 : i32
    %c0_i32_1 = arith.constant 0 : i32
    return %c0_i32, %c0_i32_0 : i32, i32
  }
  func.func @transform_4(%arg0: i32, %arg1: i32) -> (i32, i32) {
    %c0_i32 = arith.constant 0 : i32
    %c0_i32_0 = arith.constant 0 : i32
    %c0_i32_1 = arith.constant 0 : i32
    return %c0_i32, %c0_i32_0 : i32, i32
  }
  func.func @transform_5(%arg0: i32, %arg1: i32) -> i32 {
    %c0_i32 = arith.constant 0 : i32
    %c0_i32_0 = arith.constant 0 : i32
    return %c0_i32 : i32
  }
  func.func @transform_6(%arg0: i32, %arg1: i32) -> (i32, i32, i32) {
    %c0_i32 = arith.constant 0 : i32
    %c0_i32_0 = arith.constant 0 : i32
    return %arg0, %c0_i32, %arg1 : i32, i32, i32
  }
}

</mosaic_0001>

<bundles_post_ra>
// kernel: pam_module_forward.1
= control target key start
LH: loop header
LB: loop body
LE: loop exit
PB: predicated region body
PF: predicated region fallthrough
CT: control target
= control target key end

     0   :  { %s3396_s0 = inlined_call_operand.vmem [shape: f32[2,128,256], index: 0, kind: input, shape index: {}]   ;;  %s3397_s1 = inlined_call_operand.vmem [shape: bf16[128,128], index: 1, kind: input, shape index: {}]   ;;  %s3398_s2 = inlined_call_operand.vmem [shape: bf16[256,128], index: 2, kind: input, shape index: {}]   ;;  %s3399_s3 = inlined_call_operand.vmem [shape: f32[128,1], index: 3, kind: input, shape index: {}]   ;;  %s3400_s4 = inlined_call_operand.vmem [shape: f32[256,1], index: 4, kind: input, shape index: {}]   ;;  %s3401_s5 = inlined_call_operand.<no memory space> [shape: f32[1], index: 5, kind: input, shape index: {}]   ;;  %s3402_s6 = inlined_call_operand.vmem [shape: f32[2,128,256], index: 6, kind: output, shape index: {}]  }
   0x1   :  { %11 = sst [smem:[#allocation4]] %s3401_s5 }
   0x2   :  { %s2474_s23 = smov 0   ;;  %s2476_s24 = smov 0  }
   0x3   :  { %s2478_s25 = smov 0   ;;  %s2480_s26 = smov 0  }
   0x4   :  { %s2482_s27 = smov 0   ;;  %s2484_s28 = smov 0  }
   0x5   :  { %s2486_s29 = smov 0  }
   0x6 LB: > { %s26_s5 = sadd.s32 1, %s2424_s27  ;;  %s29_s30 = sadd.s32 1, %s2428_s28  ;;  %s2432_s29 = sphi %s2486_s29, %s17_s29   ;;  %s2428_s28 = sphi %s2484_s28, %s3409_s28   ;;  %s2424_s27 = sphi %s2482_s27, %s3408_s27   ;;  %s2420_s26 = sphi %s2480_s26, %s3407_s26   ;;  %s2416_s25 = sphi %s2478_s25, %s3406_s25   ;;  %s2412_s24 = sphi %s2476_s24, %s3405_s24   ;;  %s2408_s23 = sphi %s2474_s23, %s3404_s23  }
   0x7   : > { %p27_p0 = scmp.ge.s32.totalorder %s26_s5, 2  ;;  %s2012_s7 = sadd.s32 4294967295, %s2432_s29  }
   0x8   : > { %p179_p1 = scmp.ne.s32.totalorder %s2412_s24, %s2408_s23  ;;  %p180_p2 = scmp.eq.s32.totalorder %s2012_s7, 3 }
   0x9   : > { %s3411_s5 = smov (%p27_p0, %s26_s5), 0  ;;  %s3413_s30 = smov (!%p27_p0, %s29_s30), %s2428_s28 }
   0xa   : > { %s165_s8 = ssub.s32 %s2424_s27, %s3411_s5  ;;  %p31_p3 = scmp.ge.s32.totalorder %s3413_s30, 2 }
   0xb   : > { %p2016_p4 = scmp.ge.s32.totalorder %s2432_s29, 1  ;;  %p2520_p5 = por %p180_p2, %p179_p1 }
   0xc   : > { %p227_p6 = scmp.lt.s32.totalorder %s2432_s29, 5  ;;  %s3415_s30 = smov (%p31_p3, %s3413_s30), 0 }
   0xd   : > { %s164_s10 = ssub.s32 %s2428_s28, %s3415_s30  ;;  %s169_s12 = sadd.s32 1, %s2412_s24 }
   0xe   : > { %p228_p7 = pnand %p2016_p4, %p227_p6  ;;  %s166_s11 = sor.u32 %s165_s8, %s164_s10 }
   0xf   : > { %p167_p8 = scmp.eq.s32.totalorder %s166_s11, 0  ;;  %s253_s14 = sand.u32 (!%p228_p7), 1, %s2408_s23  }
  0x10   : > { %231 = sbr.rel (%p228_p7) target bundleno = 1413 (0x585), region = 44  ;;  %p256_p9 = scmp.lt.s32.totalorder (!%p228_p7), %s2420_s26, 1 }
  0x11   : > { %s2531_s13 = scalar_select %p167_p8, %s2412_s24, %s169_s12  }
  0x12   : > { %s2017_s15 = sshll.u32 (!%p228_p7), %s253_s14, 7  ;;  %p2020_p10 = scmp.ne.s32.totalorder (!%p228_p7), %s2416_s25, 0 }
  0x13   : > { %s2541_s21 = scalar_lea.vmem (!%p228_p7), [#allocation5], %s2017_s15 }
  0x17   : > { %s257_s16 = scalar_select %p256_p9, %s2420_s26, 1 }
  0x18   : > { %265 = sbr.rel (%p2020_p10) target bundleno = 513 (0x201), region = 48  ;;  %v332_v0 = vld [vmem:[%s3399_s3 + $0x10] sm:$0xff] (!%p2020_p10)  ;;  %v2434_v3 = vmov (!%p2020_p10), 0   ;;  %v333_v11 = vld [vmem:[%s3399_s3 + $0x18] sm:$0xff] (!%p2020_p10)  ;;  %v335_v22 = vld [vmem:[%s3399_s3 + $0x28] sm:$0xff] (!%p2020_p10) }
  0x19   : > { %s2053_s17 = sshll.u32 %s257_s16, 8  ;;  %2145 = vset.pattern.permute.xlu1 (!%p2020_p10), %v2434_v3  ;;  %506 = vmatprep.mubr.bf16.mxu0 (!%p2020_p10), %v2434_v3  ;;  %v337_v29 = vld [vmem:[%s3399_s3 + $0x38] sm:$0xff] (!%p2020_p10)  ;;  %v339_v36 = vld [vmem:[%s3399_s3 + $0x48] sm:$0xff] (!%p2020_p10)  ;;  %v715_v57 = vld [vmem:[%s3400_s4] sm:$0xff] (!%p2020_p10) }
  0x1a   : > { %s2539_s20 = scalar_lea.vmem %s3396_s0, %s2053_s17  ;;  %358 = vperm.xlu1 (!%p2020_p10), %2145, %v332_v0   ;;  %1075 = vmatprep.mubr.bf16.mxu1 (!%p2020_p10), %v2434_v3  ;;  %v341_v43 = vld [vmem:[%s3399_s3 + $0x58] sm:$0xff] (!%p2020_p10)  ;;  %v343_v50 = vld [vmem:[%s3399_s3 + $0x68] sm:$0xff] (!%p2020_p10)  ;;  %v2258_v58 = vld [vmem:[%s3397_s1] sm:$0xff] (!%p2020_p10)  }
  0x1b   : > { %v267_v1 = vld [vmem:[%s2539_s20 + $0x8] sm:$0xff] (!%p2020_p10)  ;;  %v269_v2 = vld [vmem:[%s2539_s20 + $0x18] sm:$0xff] (!%p2020_p10)  ;;  %v266_v5 = vld [vmem:[%s2539_s20] sm:$0xff] (!%p2020_p10)  ;;  %2144 = vset.pattern.permute.xlu0 (!%p2020_p10), %v2434_v3 }
  0x1c   : > { %v2550_v4 = vpack.c.bf16 (!%p2020_p10), %v269_v2, %v267_v1  ;;  %v268_v6 = vld [vmem:[%s2539_s20 + $0x10] sm:$0xff] (!%p2020_p10)  ;;  %v271_v8 = vld [vmem:[%s2539_s20 + $0x28] sm:$0xff] (!%p2020_p10)  ;;  %v273_v9 = vld [vmem:[%s2539_s20 + $0x38] sm:$0xff] (!%p2020_p10) }
  0x1d   : > { %v2555_v7 = vpack.c.bf16 (!%p2020_p10), %v268_v6, %v266_v5  ;;  %v270_v10 = vld [vmem:[%s2539_s20 + $0x20] sm:$0xff] (!%p2020_p10)  ;;  %v2566_v12 = vpack.c.bf16 (!%p2020_p10), %v273_v9, %v271_v8  ;;  %v272_v13 = vld [vmem:[%s2539_s20 + $0x30] sm:$0xff] (!%p2020_p10)  ;;  %v275_v14 = vld [vmem:[%s2539_s20 + $0x48] sm:$0xff] (!%p2020_p10) }
  0x1e   : > { %474 = vmatprep.subr.bf16.mxu0 (!%p2020_p10), %v2550_v4  ;;  %2054 = vmatprep.subr.bf16.mxu1 (!%p2020_p10), %v2550_v4  ;;  %v2572_v15 = vpack.c.bf16 (!%p2020_p10), %v272_v13, %v270_v10  ;;  %v277_v16 = vld [vmem:[%s2539_s20 + $0x58] sm:$0xff] (!%p2020_p10)  ;;  %v274_v18 = vld [vmem:[%s2539_s20 + $0x40] sm:$0xff] (!%p2020_p10)  ;;  %v276_v19 = vld [vmem:[%s2539_s20 + $0x50] sm:$0xff] (!%p2020_p10) }
  0x1f   : > { %475 = vmatpush1.bf16.msra.mxu0 %v2555_v7  ;;  %2062 = vmatpush1.bf16.msra.mxu1 %v2555_v7  ;;  %v2577_v17 = vpack.c.bf16 %v277_v16, %v275_v14  ;;  %v279_v20 = vld [vmem:[%s2539_s20 + $0x68] sm:$0xff]  ;;  %v281_v21 = vld [vmem:[%s2539_s20 + $0x78] sm:$0xff]  ;;  %v2589_v23 = vpack.c.bf16 %v276_v19, %v274_v18  ;;  %v278_v25 = vld [vmem:[%s2539_s20 + $0x60] sm:$0xff] }
  0x20   : > { %476 = vmatprep.subr.bf16.mxu0 %v2566_v12  ;;  %2055 = vmatprep.subr.bf16.mxu1 %v2566_v12  ;;  %v2593_v24 = vpack.c.bf16 %v281_v21, %v279_v20  ;;  %v280_v26 = vld [vmem:[%s2539_s20 + $0x70] sm:$0xff]  ;;  %v283_v27 = vld [vmem:[%s2539_s20 + $0x88] sm:$0xff]  ;;  %v285_v28 = vld [vmem:[%s2539_s20 + $0x98] sm:$0xff] }
  0x21   : > { %363 = vperm.xlu1 %2145, %v333_v11   ;;  %v2604_v30 = vpack.c.bf16 %v280_v26, %v278_v25  ;;  %v282_v31 = vld [vmem:[%s2539_s20 + $0x80] sm:$0xff]  ;;  %v2609_v32 = vpack.c.bf16 %v285_v28, %v283_v27  ;;  %v284_v33 = vld [vmem:[%s2539_s20 + $0x90] sm:$0xff]  ;;  %v287_v34 = vld [vmem:[%s2539_s20 + $0xa8] sm:$0xff] }
  0x22   : > { %v289_v35 = vld [vmem:[%s2539_s20 + $0xb8] sm:$0xff]  ;;  %v2619_v37 = vpack.c.bf16 %v284_v33, %v282_v31  ;;  %v286_v38 = vld [vmem:[%s2539_s20 + $0xa0] sm:$0xff]  ;;  %v288_v40 = vld [vmem:[%s2539_s20 + $0xb0] sm:$0xff] }
  0x23   : > { %477 = vmatpush1.bf16.msra.mxu0 %v2572_v15  ;;  %2063 = vmatpush1.bf16.msra.mxu1 %v2572_v15  ;;  %v2624_v39 = vpack.c.bf16 %v289_v35, %v287_v34  ;;  %v291_v41 = vld [vmem:[%s2539_s20 + $0xc8] sm:$0xff]  ;;  %v293_v42 = vld [vmem:[%s2539_s20 + $0xd8] sm:$0xff]  ;;  %v2634_v44 = vpack.c.bf16 %v288_v40, %v286_v38  ;;  %v290_v45 = vld [vmem:[%s2539_s20 + $0xc0] sm:$0xff] }
  0x24   : > { %478 = vmatprep.subr.bf16.mxu0 %v2577_v17  ;;  %2056 = vmatprep.subr.bf16.mxu1 %v2577_v17  ;;  %v2639_v46 = vpack.c.bf16 %v293_v42, %v291_v41  ;;  %v292_v47 = vld [vmem:[%s2539_s20 + $0xd0] sm:$0xff]  ;;  %v295_v48 = vld [vmem:[%s2539_s20 + $0xe8] sm:$0xff]  ;;  %v297_v49 = vld [vmem:[%s2539_s20 + $0xf8] sm:$0xff] }
  0x25   : > { %373 = vperm.xlu1 %2145, %v335_v22   ;;  %v2649_v51 = vpack.c.bf16 %v292_v47, %v290_v45  ;;  %v294_v52 = vld [vmem:[%s2539_s20 + $0xe0] sm:$0xff]  ;;  %v2654_v53 = vpack.c.bf16 %v297_v49, %v295_v48  ;;  %v296_v54 = vld [vmem:[%s2539_s20 + $0xf0] sm:$0xff]  ;;  %v345_v55 = vld [vmem:[%s3399_s3 + $0x78] sm:$0xff] }
  0x26   : > { %v2662_v56 = vpack.c.bf16 %v296_v54, %v294_v52  ;;  %v2259_v59 = vld [vmem:[%s3398_s2 + $0x20] sm:$0xff]   ;;  %v716_v61 = vld [vmem:[%s3400_s4 + $0x8] sm:$0xff]  ;;  %v717_v62 = vld [vmem:[%s3400_s4 + $0x10] sm:$0xff] }
  0x27   : > { %479 = vmatpush1.bf16.msra.mxu0 %v2589_v23  ;;  %2064 = vmatpush1.bf16.msra.mxu1 %v2589_v23  ;;  %v330_v60 = vld [vmem:[%s3399_s3] sm:$0xff]  ;;  %v2260_v63 = vld [vmem:[%s3397_s1 + $0x8] sm:$0xff]   ;;  %v336_v6 = vld [vmem:[%s3399_s3 + $0x30] sm:$0xff] }
  0x28   : > { %480 = vmatprep.subr.bf16.mxu0 %v2593_v24  ;;  %2057 = vmatprep.subr.bf16.mxu1 %v2593_v24  ;;  %v331_v0 = vld [vmem:[%s3399_s3 + $0x8] sm:$0xff]  ;;  %v334_v2 = vld [vmem:[%s3399_s3 + $0x20] sm:$0xff]  ;;  %v2263_v8 = vld [vmem:[%s3398_s2 + $0x30] sm:$0xff]  }
  0x29   : > { %383 = vperm.xlu1 %2145, %v337_v29   ;;  %348 = vperm.xlu0 %2144, %v330_v60   ;;  %v2261_v1 = vld [vmem:[%s3398_s2 + $0x28] sm:$0xff]   ;;  %v719_v5 = vld [vmem:[%s3400_s4 + $0x20] sm:$0xff]  ;;  %v340_v11 = vld [vmem:[%s3399_s3 + $0x50] sm:$0xff] }
  0x2a   : > { %v338_v9 = vld [vmem:[%s3399_s3 + $0x40] sm:$0xff]  ;;  %v720_v10 = vld [vmem:[%s3400_s4 + $0x28] sm:$0xff]  ;;  %v2264_v13 = vld [vmem:[%s3397_s1 + $0x18] sm:$0xff]  }
  0x2b   : > { %481 = vmatpush1.bf16.msra.mxu0 %v2604_v30  ;;  %2065 = vmatpush1.bf16.msra.mxu1 %v2604_v30  ;;  %v2265_v14 = vld [vmem:[%s3398_s2 + $0x38] sm:$0xff]   ;;  %v723_v18 = vld [vmem:[%s3400_s4 + $0x40] sm:$0xff]  ;;  %v724_v21 = vld [vmem:[%s3400_s4 + $0x48] sm:$0xff] }
  0x2c   : > { %482 = vmatprep.subr.bf16.mxu0 %v2609_v32  ;;  %2058 = vmatprep.subr.bf16.mxu1 %v2609_v32  ;;  %v722_v16 = vld [vmem:[%s3400_s4 + $0x38] sm:$0xff]  ;;  %v2266_v19 = vld [vmem:[%s3397_s1 + $0x20] sm:$0xff]   ;;  %v725_v22 = vld [vmem:[%s3400_s4 + $0x50] sm:$0xff] }
  0x2d   : > { %393 = vperm.xlu1 %2145, %v339_v36   ;;  %353 = vperm.xlu0 %2144, %v331_v0   ;;  %v2267_v20 = vld [vmem:[%s3398_s2 + $0x40] sm:$0xff]   ;;  %v726_v25 = vld [vmem:[%s3400_s4 + $0x58] sm:$0xff]  ;;  %v2270_v27 = vld [vmem:[%s3397_s1 + $0x30] sm:$0xff]  }
  0x2e   : > { %v727_v26 = vld [vmem:[%s3400_s4 + $0x60] sm:$0xff]  ;;  %v2271_v28 = vld [vmem:[%s3398_s2 + $0x50] sm:$0xff]   ;;  %v728_v29 = vld [vmem:[%s3400_s4 + $0x68] sm:$0xff] }
  0x2f   : > { %483 = vmatpush1.bf16.msra.mxu0 %v2619_v37  ;;  %2066 = vmatpush1.bf16.msra.mxu1 %v2619_v37  ;;  %v2272_v31 = vld [vmem:[%s3397_s1 + $0x38] sm:$0xff]   ;;  %v731_v34 = vld [vmem:[%s3400_s4 + $0x80] sm:$0xff]  ;;  %v733_v38 = vld [vmem:[%s3400_s4 + $0x90] sm:$0xff] }
  0x30   : > { %484 = vmatprep.subr.bf16.mxu0 %v2624_v39  ;;  %2059 = vmatprep.subr.bf16.mxu1 %v2624_v39  ;;  %v730_v33 = vld [vmem:[%s3400_s4 + $0x78] sm:$0xff]  ;;  %v2274_v35 = vld [vmem:[%s3398_s2] sm:$0xff]   ;;  %v2277_v40 = vld [vmem:[%s3398_s2 + $0x68] sm:$0xff]  }
  0x31   : > { %403 = vperm.xlu1 %2145, %v341_v43   ;;  %368 = vperm.xlu0 %2144, %v334_v2   ;;  %v2275_v36 = vld [vmem:[%s3398_s2 + $0x60] sm:$0xff]   ;;  %v734_v41 = vld [vmem:[%s3400_s4 + $0x98] sm:$0xff]  ;;  %v2278_v43 = vld [vmem:[%s3398_s2 + $0x10] sm:$0xff]  }
  0x32   : > { %v735_v42 = vld [vmem:[%s3400_s4 + $0xa0] sm:$0xff]  ;;  %v736_v45 = vld [vmem:[%s3400_s4 + $0xa8] sm:$0xff]  ;;  %v2280_v47 = vld [vmem:[%s3398_s2 + $0x18] sm:$0xff]  }
  0x33   : > { %485 = vmatpush1.bf16.msra.mxu0 %v2634_v44  ;;  %2067 = vmatpush1.bf16.msra.mxu1 %v2634_v44  ;;  %v2281_v48 = vld [vmem:[%s3398_s2 + $0x78] sm:$0xff]   ;;  %v740_v49 = vld [vmem:[%s3400_s4 + $0xc8] sm:$0xff] }
  0x34   : > { %486 = vmatprep.subr.bf16.mxu0 %v2639_v46  ;;  %2060 = vmatprep.subr.bf16.mxu1 %v2639_v46 }
  0x35   : > { %413 = vperm.xlu1 %2145, %v343_v50   ;;  %378 = vperm.xlu0 %2144, %v336_v6  }
  0x37   : > { %487 = vmatpush1.bf16.msra.mxu0 %v2649_v51  ;;  %2068 = vmatpush1.bf16.msra.mxu1 %v2649_v51 }
  0x38   : > { %488 = vmatprep.subr.bf16.mxu0 %v2654_v53  ;;  %2061 = vmatprep.subr.bf16.mxu1 %v2654_v53 }
  0x39   : > { %423 = vperm.xlu1 %2145, %v345_v55   ;;  %388 = vperm.xlu0 %2144, %v338_v9   ;;  %v743_v55 = vld [vmem:[%s3400_s4 + $0xe0] sm:$0xff] }
  0x3b   : > { %489 = vmatpush1.bf16.msra.mxu0 %v2662_v56  ;;  %2069 = vmatpush1.bf16.msra.mxu1 %v2662_v56 }
  0x3c   : > { %1003 = vmatprep.subr.bf16.mxu0 %v2550_v4  ;;  %v718_v4 = vld [vmem:[%s3400_s4 + $0x18] sm:$0xff] }
  0x3d   : > { %749 = vperm.xlu1 %2145, %v715_v57   ;;  %398 = vperm.xlu0 %2144, %v340_v11   ;;  %v744_v57 = vld [vmem:[%s3400_s4 + $0xe8] sm:$0xff] }
  0x3e   : > { %507 = vmatmul.mubr.bf16.vlgmr.msra.gmra.mrb[0].mxu0 %v2258_v58  ;;  %1076 = vmatmul.mubr.bf16.vlgmr.msra.gmra.mrb[0].mxu1 %v2259_v59  ;;  %v745_v59 = vld [vmem:[%s3400_s4 + $0xf0] sm:$0xff] }
  0x3f   : > { %516 = vmatprep.mubr.bf16.mxu0 %v2434_v3  ;;  %1085 = vmatprep.mubr.bf16.mxu1 %v2434_v3 }
  0x40   : > { %1004 = vmatpush1.bf16.msra.mxu0 %v2555_v7  ;;  %v2262_v7 = vld [vmem:[%s3397_s1 + $0x10] sm:$0xff]  }
  0x41   : > { %754 = vperm.xlu1 %2145, %v716_v61   ;;  %1005 = vmatprep.subr.bf16.mxu0 %v2566_v12  ;;  %v721_v12 = vld [vmem:[%s3400_s4 + $0x30] sm:$0xff]  ;;  %v746_v61 = vld [vmem:[%s3400_s4 + $0xf8] sm:$0xff] }
  0x44   : > { %1006 = vmatpush1.bf16.msra.mxu0 %v2572_v15  ;;  %v342_v15 = vld [vmem:[%s3399_s3 + $0x60] sm:$0xff] }
  0x45   : > { %759 = vperm.xlu1 %2145, %v717_v62   ;;  %1007 = vmatprep.subr.bf16.mxu0 %v2577_v17  ;;  %v344_v17 = vld [vmem:[%s3399_s3 + $0x70] sm:$0xff] }
  0x46   : > { %517 = vmatmul.mubr.bf16.gmra.mrb[4].mxu0 %v2260_v63  ;;  %1086 = vmatmul.mubr.bf16.gmra.mrb[4].mxu1 %v2261_v1 }
  0x47   : > { %526 = vmatprep.mubr.bf16.mxu0 %v2434_v3  ;;  %1095 = vmatprep.mubr.bf16.mxu1 %v2434_v3 }
  0x48   : > { %1008 = vmatpush1.bf16.msra.mxu0 %v2589_v23  ;;  %408 = vperm.xlu0 %2144, %v342_v15   ;;  %v2268_v23 = vld [vmem:[%s3397_s1 + $0x28] sm:$0xff]  }
  0x49   : > { %764 = vperm.xlu1 %2145, %v718_v4   ;;  %1009 = vmatprep.subr.bf16.mxu0 %v2593_v24  ;;  %v2269_v24 = vld [vmem:[%s3398_s2 + $0x48] sm:$0xff]  }
  0x4c   : > { %1010 = vmatpush1.bf16.msra.mxu0 %v2604_v30  ;;  %418 = vperm.xlu0 %2144, %v344_v17   ;;  %v729_v30 = vld [vmem:[%s3400_s4 + $0x70] sm:$0xff] }
  0x4d   : > { %769 = vperm.xlu1 %2145, %v719_v5   ;;  %1011 = vmatprep.subr.bf16.mxu0 %v2609_v32  ;;  %v2273_v32 = vld [vmem:[%s3398_s2 + $0x58] sm:$0xff]  }
  0x4e   : > { %527 = vmatmul.mubr.bf16.gmra.mrb[8].mxu0 %v2262_v7  ;;  %1096 = vmatmul.mubr.bf16.gmra.mrb[8].mxu1 %v2263_v8 }
  0x4f   : > { %536 = vmatprep.mubr.bf16.mxu0 %v2434_v3  ;;  %1105 = vmatprep.mubr.bf16.mxu1 %v2434_v3 }
  0x50   : > { %1012 = vmatpush1.bf16.msra.mxu0 %v2619_v37  ;;  %v732_v37 = vld [vmem:[%s3400_s4 + $0x88] sm:$0xff] }
  0x51   : > { %774 = vperm.xlu1 %2145, %v720_v10   ;;  %1013 = vmatprep.subr.bf16.mxu0 %v2624_v39  ;;  %v2276_v39 = vld [vmem:[%s3398_s2 + $0x8] sm:$0xff]  }
  0x54   : > { %1014 = vmatpush1.bf16.msra.mxu0 %v2634_v44  ;;  %v2279_v44 = vld [vmem:[%s3398_s2 + $0x70] sm:$0xff]  }
  0x55   : > { %779 = vperm.xlu1 %2145, %v721_v12   ;;  %1015 = vmatprep.subr.bf16.mxu0 %v2639_v46  ;;  %v737_v46 = vld [vmem:[%s3400_s4 + $0xb0] sm:$0xff] }
  0x56   : > { %537 = vmatmul.mubr.bf16.gmra.mrb[12].mxu0 %v2264_v13  ;;  %1106 = vmatmul.mubr.bf16.gmra.mrb[12].mxu1 %v2265_v14 }
  0x57   : > { %546 = vmatprep.mubr.bf16.mxu0 %v2434_v3  ;;  %1115 = vmatprep.mubr.bf16.mxu1 %v2434_v3 }
  0x58   : > { %1016 = vmatpush1.bf16.msra.mxu0 %v2649_v51  ;;  %v741_v51 = vld [vmem:[%s3400_s4 + $0xd0] sm:$0xff] }
  0x59   : > { %784 = vperm.xlu1 %2145, %v722_v16   ;;  %1017 = vmatprep.subr.bf16.mxu0 %v2654_v53  ;;  %v742_v53 = vld [vmem:[%s3400_s4 + $0xd8] sm:$0xff] }
  0x5c   : > { %1018 = vmatpush1.bf16.msra.mxu0 %v2662_v56 }
  0x5d   : > { %789 = vperm.xlu1 %2145, %v723_v18  }
  0x5e   : > { %547 = vmatmul.mubr.bf16.gmra.mrb[16].mxu0 %v2266_v19  ;;  %1116 = vmatmul.mubr.bf16.gmra.mrb[16].mxu1 %v2267_v20 }
  0x5f   : > { %556 = vmatprep.mubr.bf16.mxu0 %v2434_v3  ;;  %1125 = vmatprep.mubr.bf16.mxu1 %v2434_v3 }
  0x61   : > { %794 = vperm.xlu1 %2145, %v724_v21  }
  0x65   : > { %799 = vperm.xlu1 %2145, %v725_v22  }
  0x66   : > { %557 = vmatmul.mubr.bf16.gmra.mrb[20].mxu0 %v2268_v23  ;;  %1126 = vmatmul.mubr.bf16.gmra.mrb[20].mxu1 %v2269_v24 }
  0x67   : > { %566 = vmatprep.mubr.bf16.mxu0 %v2434_v3  ;;  %1135 = vmatprep.mubr.bf16.mxu1 %v2434_v3 }
  0x69   : > { %804 = vperm.xlu1 %2145, %v726_v25  }
  0x6d   : > { %809 = vperm.xlu1 %2145, %v727_v26  }
  0x6e   : > { %567 = vmatmul.mubr.bf16.gmra.mrb[24].mxu0 %v2270_v27  ;;  %1136 = vmatmul.mubr.bf16.gmra.mrb[24].mxu1 %v2271_v28 }
  0x6f   : > { %576 = vmatprep.mubr.bf16.mxu0 %v2434_v3  ;;  %1145 = vmatprep.mubr.bf16.mxu1 %v2434_v3 }
  0x71   : > { %814 = vperm.xlu1 %2145, %v728_v29  }
  0x75   : > { %819 = vperm.xlu1 %2145, %v729_v30  }
  0x76   : > { %577 = vmatmul.mubr.bf16.gmra.mrb[28].mxu0 %v2272_v31  ;;  %1146 = vmatmul.mubr.bf16.gmra.mrb[28].mxu1 %v2273_v32 }
  0x77   : > { %1035 = vmatprep.mubr.bf16.mxu0 %v2434_v3  ;;  %1155 = vmatprep.mubr.bf16.mxu1 %v2434_v3 }
  0x79   : > { %824 = vperm.xlu1 %2145, %v730_v33  }
  0x7d   : > { %829 = vperm.xlu1 %2145, %v731_v34  }
  0x7e   : > { %1036 = vmatmul.mubr.bf16.vlgmr.msra.gmra.mrb[32].mxu0 %v2274_v35  ;;  %1156 = vmatmul.mubr.bf16.gmra.mrb[32].mxu1 %v2275_v36 }
  0x7f   : > { %1045 = vmatprep.mubr.bf16.mxu0 %v2434_v3  ;;  %1165 = vmatprep.mubr.bf16.mxu1 %v2434_v3 }
  0x81   : > { %834 = vperm.xlu1 %2145, %v732_v37  }
  0x85   : > { %839 = vperm.xlu1 %2145, %v733_v38  }
  0x86   : > { %1046 = vmatmul.mubr.bf16.gmra.mrb[36].mxu0 %v2276_v39  ;;  %1166 = vmatmul.mubr.bf16.gmra.mrb[36].mxu1 %v2277_v40 }
  0x87   : > { %1055 = vmatprep.mubr.bf16.mxu0 %v2434_v3  ;;  %1175 = vmatprep.mubr.bf16.mxu1 %v2434_v3 }
  0x89   : > { %844 = vperm.xlu1 %2145, %v734_v41  }
  0x8d   : > { %849 = vperm.xlu1 %2145, %v735_v42  }
  0x8e   : > { %1056 = vmatmul.mubr.bf16.gmra.mrb[40].mxu0 %v2278_v43  ;;  %1176 = vmatmul.mubr.bf16.gmra.mrb[40].mxu1 %v2279_v44 }
  0x8f   : > { %1065 = vmatprep.mubr.bf16.mxu0 %v2434_v3  ;;  %1185 = vmatprep.mubr.bf16.mxu1 %v2434_v3  ;;  %v739_v3 = vld [vmem:[%s3400_s4 + $0xc0] sm:$0xff] }
  0x91   : > { %854 = vperm.xlu1 %2145, %v736_v45  }
  0x95   : > { %859 = vperm.xlu1 %2145, %v737_v46  }
  0x96   : > { %1066 = vmatmul.mubr.bf16.gmra.mrb[44].mxu0 %v2280_v47  ;;  %1186 = vmatmul.mubr.bf16.gmra.mrb[44].mxu1 %v2281_v48 }
  0x99   : > { %869 = vperm.xlu1 %2145, %v739_v3   ;;  %v2877_v50 = vpop.permute.xlu1 %358 }
  0x9d   : > { %874 = vperm.xlu1 %2145, %v740_v49  }
  0xa0   : > { %v2882_v52 = vpop.permute.xlu1 %363 }
  0xa1   : > { %879 = vperm.xlu1 %2145, %v741_v51  }
  0xa4   : > { %v2887_v54 = vpop.permute.xlu1 %373 }
  0xa5   : > { %884 = vperm.xlu1 %2145, %v742_v53  }
  0xa8   : > { %v2892_v56 = vpop.permute.xlu1 %383  ;;  %v349_v19 = vpop.permute.xlu0 %348 }
  0xa9   : > { %889 = vperm.xlu1 %2145, %v743_v55  }
  0xac   : > { %v2897_v58 = vpop.permute.xlu1 %393  ;;  %v354_v21 = vpop.permute.xlu0 %353 }
  0xad   : > { %894 = vperm.xlu1 %2145, %v744_v57  }
  0xb0   : > { %v2902_v60 = vpop.permute.xlu1 %403 }
  0xb1   : > { %899 = vperm.xlu1 %2145, %v745_v59  }
  0xb4   : > { %v2907_v62 = vpop.permute.xlu1 %413 }
  0xb5   : > { %904 = vperm.xlu1 %2145, %v746_v61  }
  0xb8   : > { %v2909_v63 = vpop.permute.xlu1 %423 }
  0xbc   : > { %v2911_v0 = vpop.permute.xlu1 %749 }
  0xc0   : > { %v2913_v1 = vpop.permute.xlu1 %754 }
  0xc4   : > { %v2915_v2 = vpop.permute.xlu1 %759 }
  0xc8   : > { %v2917_v4 = vpop.permute.xlu1 %764 }
  0xcc   : > { %v2919_v5 = vpop.permute.xlu1 %769 }
  0xd0   : > { %v2921_v6 = vpop.permute.xlu1 %774 }
  0xd4   : > { %v2923_v7 = vpop.permute.xlu1 %779 }
  0xd8   : > { %v2925_v8 = vpop.permute.xlu1 %784 }
  0xdc   : > { %v790_v9 = vpop.permute.xlu1 %789 }
  0xe0   : > { %v795_v10 = vpop.permute.xlu1 %794 }
  0xe4   : > { %v800_v11 = vpop.permute.xlu1 %799 }
  0xe8   : > { %v805_v12 = vpop.permute.xlu1 %804 }
  0xec   : > { %v2927_v13 = vpop.permute.xlu1 %809 }
  0xf0   : > { %v2929_v14 = vpop.permute.xlu1 %814 }
  0xf4   : > { %v2931_v15 = vpop.permute.xlu1 %819 }
  0xf8   : > { %v2933_v16 = vpop.permute.xlu1 %824 }
  0xfc   : > { %v2935_v17 = vpop.permute.xlu1 %829 }
 0x100   : > { %v2937_v18 = vpop.permute.xlu1 %834 }
 0x104   : > { %v2939_v20 = vpop.permute.xlu1 %839 }
 0x108   : > { %v2941_v22 = vpop.permute.xlu1 %844 }
 0x10c   : > { %v2943_v42 = vpop.permute.xlu1 %849 }
 0x111   : > { %v508_v23 = vpop.f32.mrb[0].mxu0  ;;  %v1077_v24 = vpop.f32.mrb[0].mxu1 }
 0x112   : > { %v509_v25 = vadd.f32 %v508_v23, %v349_v19  ;;  %v510_v26 = vpop.f32.mrb[1].mxu0  ;;  %v1078_v27 = vadd.f32 %v1077_v24, %v790_v9  ;;  %v1079_v28 = vpop.f32.mrb[1].mxu1 }
 0x113   : > { %v511_v29 = vadd.f32 %v510_v26, %v349_v19  ;;  %v512_v30 = vpop.f32.mrb[2].mxu0  ;;  %v1081_v31 = vpop.f32.mrb[2].mxu1  ;;  %v1080_v34 = vadd.f32 %v1079_v28, %v790_v9 }
 0x114   : > { %v513_v32 = vadd.f32 %v512_v30, %v354_v21  ;;  %v514_v33 = vpop.f32.mrb[3].mxu0  ;;  %v1082_v35 = vadd.f32 %v1081_v31, %v795_v10  ;;  %v1083_v38 = vpop.f32.mrb[3].mxu1 }
 0x115   : > { %v2146_v36 = vpack.i.bf16 %v511_v29, %v509_v25  ;;  %v515_v37 = vadd.f32 %v514_v33, %v354_v21  ;;  %v1084_v40 = vadd.f32 %v1083_v38, %v795_v10  ;;  %v369_v25 = vpop.permute.xlu0 %368  ;;  %v2949_v26 = vpop.permute.xlu1 %854 }
 0x116   : > { %v1204_v39 = vpack.c.bf16 %v1082_v35, %v1078_v27 }
 0x117   : > { %v2148_v41 = vpack.i.bf16 %v515_v37, %v513_v32  ;;  %2147 = vxpose.xlu0.b32.start [1/16] %v2146_v36, 128  ;;  %v1205_v43 = vpack.c.bf16 %v1084_v40, %v1080_v34 }
 0x118   : > { %1236 = vst [vmem:[#allocation3 + $0x40] sm:$0xff] %v1204_v39 }
 0x119   : > { %v518_v44 = vpop.f32.mrb[4].mxu0  ;;  %v1087_v45 = vpop.f32.mrb[4].mxu1  ;;  %1237 = vst [vmem:[#allocation3 + $0x48] sm:$0xff] %v1205_v43 }
 0x11a   : > { %v519_v46 = vadd.f32 %v518_v44, %v2877_v50  ;;  %v1088_v47 = vadd.f32 %v1087_v45, %v800_v11  ;;  %v520_v48 = vpop.f32.mrb[5].mxu0  ;;  %v1089_v3 = vpop.f32.mrb[5].mxu1 }
 0x11b   : > { %v521_v49 = vadd.f32 %v520_v48, %v2877_v50  ;;  %v522_v51 = vpop.f32.mrb[6].mxu0  ;;  %v1091_v53 = vpop.f32.mrb[6].mxu1  ;;  %2149 = vxpose.xlu0.b32.cont [2/16] %v2148_v41, 128  ;;  %v1090_v19 = vadd.f32 %v1089_v3, %v800_v11 }
 0x11c   : > { %v523_v55 = vadd.f32 %v522_v51, %v2882_v52  ;;  %v1092_v57 = vadd.f32 %v1091_v53, %v805_v12  ;;  %v524_v59 = vpop.f32.mrb[7].mxu0  ;;  %v1093_v10 = vpop.f32.mrb[7].mxu1 }
 0x11d   : > { %v2150_v61 = vpack.i.bf16 %v521_v49, %v519_v46  ;;  %v525_v9 = vadd.f32 %v524_v59, %v2882_v52  ;;  %v1094_v23 = vadd.f32 %v1093_v10, %v805_v12  ;;  %v379_v44 = vpop.permute.xlu0 %378  ;;  %v2957_v45 = vpop.permute.xlu1 %859 }
 0x11e   : > { %v1206_v21 = vpack.c.bf16 %v1092_v57, %v1088_v47 }
 0x11f   : > { %v2152_v24 = vpack.i.bf16 %v525_v9, %v523_v55  ;;  %2151 = vxpose.xlu0.b32.cont [3/16] %v2150_v61, 128  ;;  %v1207_v50 = vpack.c.bf16 %v1094_v23, %v1090_v19 }
 0x120   : > { %1238 = vst [vmem:[#allocation3 + $0x50] sm:$0xff] %v1206_v21 }
 0x121   : > { %v528_v27 = vpop.f32.mrb[8].mxu0  ;;  %v1097_v28 = vpop.f32.mrb[8].mxu1  ;;  %1239 = vst [vmem:[#allocation3 + $0x58] sm:$0xff] %v1207_v50 }
 0x122   : > { %v529_v29 = vadd.f32 %v528_v27, %v369_v25  ;;  %v530_v30 = vpop.f32.mrb[9].mxu0  ;;  %v1099_v31 = vpop.f32.mrb[9].mxu1  ;;  %v1098_v11 = vadd.f32 %v1097_v28, %v2927_v13 }
 0x123   : > { %v531_v32 = vadd.f32 %v530_v30, %v369_v25  ;;  %v532_v33 = vpop.f32.mrb[10].mxu0  ;;  %v1101_v52 = vpop.f32.mrb[10].mxu1  ;;  %2153 = vxpose.xlu0.b32.cont [4/16] %v2152_v24, 128  ;;  %v1100_v39 = vadd.f32 %v1099_v31, %v2927_v13 }
 0x124   : > { %v533_v12 = vadd.f32 %v532_v33, %v2887_v54  ;;  %v1102_v34 = vadd.f32 %v1101_v52, %v2929_v14  ;;  %v534_v35 = vpop.f32.mrb[11].mxu0  ;;  %v1103_v38 = vpop.f32.mrb[11].mxu1 }
 0x125   : > { %v2154_v36 = vpack.i.bf16 %v531_v32, %v529_v29  ;;  %v535_v37 = vadd.f32 %v534_v35, %v2887_v54  ;;  %v1104_v41 = vadd.f32 %v1103_v38, %v2929_v14  ;;  %v389_v25 = vpop.permute.xlu0 %388  ;;  %v2965_v50 = vpop.permute.xlu1 %869 }
 0x126   : > { %v1208_v40 = vpack.c.bf16 %v1102_v34, %v1098_v11 }
 0x127   : > { %v2156_v43 = vpack.i.bf16 %v535_v37, %v533_v12  ;;  %2155 = vxpose.xlu0.b32.cont [5/16] %v2154_v36, 128  ;;  %v1209_v46 = vpack.c.bf16 %v1104_v41, %v1100_v39 }
 0x128   : > { %1240 = vst [vmem:[#allocation3 + $0x60] sm:$0xff] %v1208_v40 }
 0x129   : > { %v538_v47 = vpop.f32.mrb[12].mxu0  ;;  %v1107_v48 = vpop.f32.mrb[12].mxu1  ;;  %1241 = vst [vmem:[#allocation3 + $0x68] sm:$0xff] %v1209_v46 }
 0x12a   : > { %v539_v3 = vadd.f32 %v538_v47, %v379_v44  ;;  %v540_v49 = vpop.f32.mrb[13].mxu0  ;;  %v1109_v51 = vpop.f32.mrb[13].mxu1  ;;  %v1108_v13 = vadd.f32 %v1107_v48, %v2931_v15 }
 0x12b   : > { %v541_v54 = vadd.f32 %v540_v49, %v379_v44  ;;  %v542_v53 = vpop.f32.mrb[14].mxu0  ;;  %v1111_v55 = vpop.f32.mrb[14].mxu1  ;;  %2157 = vxpose.xlu0.b32.cont [6/16] %v2156_v43, 128  ;;  %v1110_v19 = vadd.f32 %v1109_v51, %v2931_v15 }
 0x12c   : > { %v543_v14 = vadd.f32 %v542_v53, %v2892_v56  ;;  %v1112_v57 = vadd.f32 %v1111_v55, %v2933_v16  ;;  %v544_v59 = vpop.f32.mrb[15].mxu0  ;;  %v1113_v10 = vpop.f32.mrb[15].mxu1 }
 0x12d   : > { %v2158_v61 = vpack.i.bf16 %v541_v54, %v539_v3  ;;  %v545_v9 = vadd.f32 %v544_v59, %v2892_v56  ;;  %v1114_v23 = vadd.f32 %v1113_v10, %v2933_v16  ;;  %v399_v41 = vpop.permute.xlu0 %398  ;;  %v2973_v43 = vpop.permute.xlu1 %874 }
 0x12e   : > { %v1210_v21 = vpack.c.bf16 %v1112_v57, %v1108_v13 }
 0x12f   : > { %v2160_v24 = vpack.i.bf16 %v545_v9, %v543_v14  ;;  %2159 = vxpose.xlu0.b32.cont [7/16] %v2158_v61, 128  ;;  %v1211_v27 = vpack.c.bf16 %v1114_v23, %v1110_v19 }
 0x130   : > { %1242 = vst [vmem:[#allocation3 + $0x70] sm:$0xff] %v1210_v21 }
 0x131   : > { %v548_v28 = vpop.f32.mrb[16].mxu0  ;;  %v1117_v29 = vpop.f32.mrb[16].mxu1  ;;  %1243 = vst [vmem:[#allocation3 + $0x78] sm:$0xff] %v1211_v27 }
 0x132   : > { %v549_v30 = vadd.f32 %v548_v28, %v389_v25  ;;  %v550_v31 = vpop.f32.mrb[17].mxu0  ;;  %v1119_v32 = vpop.f32.mrb[17].mxu1  ;;  %v1118_v15 = vadd.f32 %v1117_v29, %v2935_v17 }
 0x133   : > { %v551_v56 = vadd.f32 %v550_v31, %v389_v25  ;;  %v552_v33 = vpop.f32.mrb[18].mxu0  ;;  %v1121_v52 = vpop.f32.mrb[18].mxu1  ;;  %2161 = vxpose.xlu0.b32.cont [8/16] %v2160_v24, 128  ;;  %v1120_v37 = vadd.f32 %v1119_v32, %v2935_v17 }
 0x134   : > { %v553_v16 = vadd.f32 %v552_v33, %v2897_v58  ;;  %v1122_v11 = vadd.f32 %v1121_v52, %v2937_v18  ;;  %v554_v12 = vpop.f32.mrb[19].mxu0  ;;  %v1123_v36 = vpop.f32.mrb[19].mxu1 }
 0x135   : > { %v2162_v34 = vpack.i.bf16 %v551_v56, %v549_v30  ;;  %v555_v35 = vadd.f32 %v554_v12, %v2897_v58  ;;  %v1124_v39 = vadd.f32 %v1123_v36, %v2937_v18  ;;  %v409_v21 = vpop.permute.xlu0 %408  ;;  %v2981_v23 = vpop.permute.xlu1 %879 }
 0x136   : > { %v1212_v38 = vpack.c.bf16 %v1122_v11, %v1118_v15 }
 0x137   : > { %v2164_v40 = vpack.i.bf16 %v555_v35, %v553_v16  ;;  %2163 = vxpose.xlu0.b32.cont [9/16] %v2162_v34, 128  ;;  %v1213_v44 = vpack.c.bf16 %v1124_v39, %v1120_v37 }
 0x138   : > { %1244 = vst [vmem:[#allocation3 + $0x80] sm:$0xff] %v1212_v38 }
 0x139   : > { %v558_v46 = vpop.f32.mrb[20].mxu0  ;;  %v1127_v47 = vpop.f32.mrb[20].mxu1  ;;  %1245 = vst [vmem:[#allocation3 + $0x88] sm:$0xff] %v1213_v44 }
 0x13a   : > { %v559_v48 = vadd.f32 %v558_v46, %v399_v41  ;;  %v560_v3 = vpop.f32.mrb[21].mxu0  ;;  %v1129_v49 = vpop.f32.mrb[21].mxu1  ;;  %v1128_v17 = vadd.f32 %v1127_v47, %v2939_v20 }
 0x13b   : > { %v561_v58 = vadd.f32 %v560_v3, %v399_v41  ;;  %v562_v51 = vpop.f32.mrb[22].mxu0  ;;  %v1131_v54 = vpop.f32.mrb[22].mxu1  ;;  %2165 = vxpose.xlu0.b32.cont [10/16] %v2164_v40, 128  ;;  %v1130_v57 = vadd.f32 %v1129_v49, %v2939_v20 }
 0x13c   : > { %v563_v18 = vadd.f32 %v562_v51, %v2902_v60  ;;  %v1132_v53 = vadd.f32 %v1131_v54, %v2941_v22  ;;  %v564_v55 = vpop.f32.mrb[23].mxu0  ;;  %v1133_v13 = vpop.f32.mrb[23].mxu1 }
 0x13d   : > { %v2166_v14 = vpack.i.bf16 %v561_v58, %v559_v48  ;;  %v565_v59 = vadd.f32 %v564_v55, %v2902_v60  ;;  %v1134_v61 = vadd.f32 %v1133_v13, %v2941_v22  ;;  %v419_v36 = vpop.permute.xlu0 %418  ;;  %v2989_v37 = vpop.permute.xlu1 %884 }
 0x13e   : > { %v1214_v9 = vpack.c.bf16 %v1132_v53, %v1128_v17 }
 0x13f   : > { %v2168_v10 = vpack.i.bf16 %v565_v59, %v563_v18  ;;  %v1215_v19 = vpack.c.bf16 %v1134_v61, %v1130_v57  ;;  %2167 = vxpose.xlu0.b32.cont [11/16] %v2166_v14, 128 }
 0x140   : > { %1246 = vst [vmem:[#allocation3 + $0x90] sm:$0xff] %v1214_v9 }
 0x141   : > { %1247 = vst [vmem:[#allocation3 + $0x98] sm:$0xff] %v1215_v19  ;;  %v568_v24 = vpop.f32.mrb[24].mxu0  ;;  %v1137_v25 = vpop.f32.mrb[24].mxu1 }
 0x142   : > { %v569_v27 = vadd.f32 %v568_v24, %v409_v21  ;;  %v570_v28 = vpop.f32.mrb[25].mxu0  ;;  %v1139_v29 = vpop.f32.mrb[25].mxu1  ;;  %v1138_v60 = vadd.f32 %v1137_v25, %v2943_v42 }
 0x143   : > { %v571_v30 = vadd.f32 %v570_v28, %v409_v21  ;;  %v572_v20 = vpop.f32.mrb[26].mxu0  ;;  %v1141_v31 = vpop.f32.mrb[26].mxu1  ;;  %2169 = vxpose.xlu0.b32.cont [12/16] %v2168_v10, 128  ;;  %v1140_v15 = vadd.f32 %v1139_v29, %v2943_v42 }
 0x144   : > { %v573_v22 = vadd.f32 %v572_v20, %v2907_v62  ;;  %v1142_v32 = vadd.f32 %v1141_v31, %v2949_v26  ;;  %v574_v56 = vpop.f32.mrb[27].mxu0  ;;  %v1143_v33 = vpop.f32.mrb[27].mxu1 }
 0x145   : > { %v2170_v52 = vpack.i.bf16 %v571_v30, %v569_v27  ;;  %v575_v16 = vadd.f32 %v574_v56, %v2907_v62  ;;  %v1144_v11 = vadd.f32 %v1143_v33, %v2949_v26  ;;  %v3003_v17 = vpop.permute.xlu1 %889 }
 0x146   : > { %v1216_v12 = vpack.c.bf16 %v1142_v32, %v1138_v60 }
 0x147   : > { %v2172_v34 = vpack.i.bf16 %v575_v16, %v573_v22  ;;  %v1217_v35 = vpack.c.bf16 %v1144_v11, %v1140_v15  ;;  %2171 = vxpose.xlu0.b32.cont [13/16] %v2170_v52, 128 }
 0x148   : > { %1248 = vst [vmem:[#allocation3 + $0xa0] sm:$0xff] %v1216_v12 }
 0x149   : > { %1249 = vst [vmem:[#allocation3 + $0xa8] sm:$0xff] %v1217_v35  ;;  %v578_v38 = vpop.f32.mrb[28].mxu0  ;;  %v1147_v39 = vpop.f32.mrb[28].mxu1 }
 0x14a   : > { %v579_v40 = vadd.f32 %v578_v38, %v419_v36  ;;  %v2992_v41 = vadd.f32 %v1147_v39, %v2957_v45  ;;  %v580_v42 = vpop.f32.mrb[29].mxu0  ;;  %v1149_v44 = vpop.f32.mrb[29].mxu1 }
 0x14b   : > { %v581_v62 = vadd.f32 %v580_v42, %v419_v36  ;;  %v2995_v26 = vadd.f32 %v1149_v44, %v2957_v45  ;;  %v582_v46 = vpop.f32.mrb[30].mxu0  ;;  %2173 = vxpose.xlu0.b32.cont [14/16] %v2172_v34, 128  ;;  %v2997_v47 = vpop.f32.mrb[30].mxu1 }
 0x14c   : > { %v583_v48 = vadd.f32 %v582_v46, %v2909_v63  ;;  %v584_v3 = vpop.f32.mrb[31].mxu0  ;;  %v3000_v49 = vpop.f32.mrb[31].mxu1 }
 0x14d   : > { %v2174_v58 = vpack.i.bf16 %v581_v62, %v579_v40  ;;  %v585_v51 = vadd.f32 %v584_v3, %v2909_v63  ;;  %v895_v20 = vpop.permute.xlu1 %894 }
 0x14f   : > { %v2176_v54 = vpack.i.bf16 %v585_v51, %v583_v48  ;;  %2175 = vxpose.xlu0.b32.cont [15/16] %v2174_v58, 128 }
 0x151   : > { %v1037_v18 = vpop.f32.mrb[32].mxu0  ;;  %v1157_v53 = vpop.f32.mrb[32].mxu1 }
 0x152   : > { %v1039_v45 = vpop.f32.mrb[33].mxu0  ;;  %v1159_v55 = vpop.f32.mrb[33].mxu1  ;;  %v1038_v57 = vadd.f32 %v1037_v18, %v2911_v0  ;;  %v1158_v59 = vadd.f32 %v1157_v53, %v2965_v50 }
 0x153   : > { %v1041_v13 = vpop.f32.mrb[34].mxu0  ;;  %v1161_v14 = vpop.f32.mrb[34].mxu1  ;;  %2177 = vxpose.xlu0.b32.end [16/16] %v2176_v54, 128  ;;  %v1040_v19 = vadd.f32 %v1039_v45, %v2911_v0  ;;  %v1160_v21 = vadd.f32 %v1159_v55, %v2965_v50 }
 0x154   : > { %v1042_v61 = vadd.f32 %v1041_v13, %v2913_v1  ;;  %v1162_v9 = vadd.f32 %v1161_v14, %v2973_v43  ;;  %v1043_v63 = vpop.f32.mrb[35].mxu0  ;;  %v1163_v10 = vpop.f32.mrb[35].mxu1 }
 0x155   : > { %v1044_v24 = vadd.f32 %v1043_v63, %v2913_v1  ;;  %v1164_v25 = vadd.f32 %v1163_v10, %v2973_v43  ;;  %v900_v40 = vpop.permute.xlu1 %899 }
 0x156   : > { %v1196_v27 = vpack.c.bf16 %v1042_v61, %v1038_v57  ;;  %v1220_v28 = vpack.c.bf16 %v1162_v9, %v1158_v59 }
 0x157   : > { %v1197_v29 = vpack.c.bf16 %v1044_v24, %v1040_v19  ;;  %v1221_v30 = vpack.c.bf16 %v1164_v25, %v1160_v21 }
 0x158   : > { %1228 = vst [vmem:[#allocation3] sm:$0xff] %v1196_v27  ;;  %1252 = vst [vmem:[#allocation3 + $0xc0] sm:$0xff] %v1220_v28 }
 0x159   : > { %1229 = vst [vmem:[#allocation3 + $0x8] sm:$0xff] %v1197_v29  ;;  %1253 = vst [vmem:[#allocation3 + $0xc8] sm:$0xff] %v1221_v30  ;;  %v1047_v31 = vpop.f32.mrb[36].mxu0  ;;  %v1167_v60 = vpop.f32.mrb[36].mxu1 }
 0x15a   : > { %v1049_v22 = vpop.f32.mrb[37].mxu0  ;;  %v1169_v32 = vpop.f32.mrb[37].mxu1  ;;  %v1048_v50 = vadd.f32 %v1047_v31, %v2915_v2  ;;  %v1168_v1 = vadd.f32 %v1167_v60, %v2981_v23 }
 0x15b   : > { %v1051_v0 = vpop.f32.mrb[38].mxu0  ;;  %v1171_v56 = vpop.f32.mrb[38].mxu1  ;;  %v1050_v16 = vadd.f32 %v1049_v22, %v2915_v2  ;;  %v1170_v11 = vadd.f32 %v1169_v32, %v2981_v23 }
 0x15c   : > { %v1052_v43 = vadd.f32 %v1051_v0, %v2917_v4  ;;  %v1172_v33 = vadd.f32 %v1171_v56, %v2989_v37  ;;  %v1053_v52 = vpop.f32.mrb[39].mxu0  ;;  %v1173_v15 = vpop.f32.mrb[39].mxu1  ;;  %v738_v0 = vld [vmem:[%s3400_s4 + $0xb8] sm:$0xff] }
 0x15d   : > { %v1054_v12 = vadd.f32 %v1053_v52, %v2917_v4  ;;  %v1174_v34 = vadd.f32 %v1173_v15, %v2989_v37  ;;  %v905_v59 = vpop.permute.xlu1 %904 }
 0x15e   : > { %v1198_v35 = vpack.c.bf16 %v1052_v43, %v1048_v50  ;;  %v1222_v36 = vpack.c.bf16 %v1172_v33, %v1168_v1 }
 0x15f   : > { %v1199_v38 = vpack.c.bf16 %v1054_v12, %v1050_v16  ;;  %v1223_v39 = vpack.c.bf16 %v1174_v34, %v1170_v11 }
 0x160   : > { %1230 = vst [vmem:[#allocation3 + $0x10] sm:$0xff] %v1198_v35  ;;  %1254 = vst [vmem:[#allocation3 + $0xd0] sm:$0xff] %v1222_v36 }
 0x161   : > { %1231 = vst [vmem:[#allocation3 + $0x18] sm:$0xff] %v1199_v38  ;;  %1255 = vst [vmem:[#allocation3 + $0xd8] sm:$0xff] %v1223_v39  ;;  %v1057_v42 = vpop.f32.mrb[40].mxu0  ;;  %v1177_v44 = vpop.f32.mrb[40].mxu1 }
 0x162   : > { %v1059_v62 = vpop.f32.mrb[41].mxu0  ;;  %v1179_v46 = vpop.f32.mrb[41].mxu1  ;;  %v1058_v23 = vadd.f32 %v1057_v42, %v2919_v5  ;;  %v1178_v4 = vadd.f32 %v1177_v44, %v3003_v17 }
 0x163   : > { %v1061_v2 = vpop.f32.mrb[42].mxu0  ;;  %v1181_v48 = vpop.f32.mrb[42].mxu1  ;;  %v1060_v54 = vadd.f32 %v1059_v62, %v2919_v5  ;;  %v1180_v18 = vadd.f32 %v1179_v46, %v3003_v17 }
 0x164   : > { %v1062_v37 = vadd.f32 %v1061_v2, %v2921_v6  ;;  %v1182_v3 = vadd.f32 %v1181_v48, %v895_v20  ;;  %v1063_v58 = vpop.f32.mrb[43].mxu0  ;;  %v1183_v51 = vpop.f32.mrb[43].mxu1 }
 0x165   : > { %v1064_v53 = vadd.f32 %v1063_v58, %v2921_v6  ;;  %v1184_v45 = vadd.f32 %v1183_v51, %v895_v20 }
 0x166   : > { %v1200_v55 = vpack.c.bf16 %v1062_v37, %v1058_v23  ;;  %v1224_v13 = vpack.c.bf16 %v1182_v3, %v1178_v4 }
 0x167   : > { %v1201_v14 = vpack.c.bf16 %v1064_v53, %v1060_v54  ;;  %v1225_v57 = vpack.c.bf16 %v1184_v45, %v1180_v18 }
 0x168   : > { %1232 = vst [vmem:[#allocation3 + $0x20] sm:$0xff] %v1200_v55  ;;  %1256 = vst [vmem:[#allocation3 + $0xe0] sm:$0xff] %v1224_v13 }
 0x169   : > { %1233 = vst [vmem:[#allocation3 + $0x28] sm:$0xff] %v1201_v14  ;;  %1257 = vst [vmem:[#allocation3 + $0xe8] sm:$0xff] %v1225_v57  ;;  %v1067_v61 = vpop.f32.mrb[44].mxu0  ;;  %v1187_v9 = vpop.f32.mrb[44].mxu1 }
 0x16a   : > { %v1069_v63 = vpop.f32.mrb[45].mxu0  ;;  %v1189_v10 = vpop.f32.mrb[45].mxu1  ;;  %v1068_v17 = vadd.f32 %v1067_v61, %v2923_v7  ;;  %v1188_v21 = vadd.f32 %v1187_v9, %v900_v40 }
 0x16b   : > { %v1071_v19 = vpop.f32.mrb[46].mxu0  ;;  %v1191_v5 = vpop.f32.mrb[46].mxu1  ;;  %v1070_v28 = vadd.f32 %v1069_v63, %v2923_v7  ;;  %v1190_v29 = vadd.f32 %v1189_v10, %v900_v40 }
 0x16c   : > { %v1072_v6 = vadd.f32 %v1071_v19, %v2925_v8  ;;  %v1192_v24 = vadd.f32 %v1191_v5, %v905_v59  ;;  %v1073_v25 = vpop.f32.mrb[47].mxu0  ;;  %v1193_v27 = vpop.f32.mrb[47].mxu1 }
 0x16d   : > { %v1074_v30 = vadd.f32 %v1073_v25, %v2925_v8  ;;  %v1194_v20 = vadd.f32 %v1193_v27, %v905_v59 }
 0x16e   : > { %v1202_v31 = vpack.c.bf16 %v1072_v6, %v1068_v17  ;;  %v1226_v60 = vpack.c.bf16 %v1192_v24, %v1188_v21 }
 0x16f   : > { %v1203_v22 = vpack.c.bf16 %v1074_v30, %v1070_v28  ;;  %v1227_v32 = vpack.c.bf16 %v1194_v20, %v1190_v29 }
 0x170   : > { %1234 = vst [vmem:[#allocation3 + $0x30] sm:$0xff] %v1202_v31  ;;  %1258 = vst [vmem:[#allocation3 + $0xf0] sm:$0xff] %v1226_v60 }
 0x171   : > { %1235 = vst [vmem:[#allocation3 + $0x38] sm:$0xff] %v1203_v22  ;;  %1259 = vst [vmem:[#allocation3 + $0xf8] sm:$0xff] %v1227_v32 }
 0x17c   : > { %864 = vperm.xlu0 %2144, %v738_v0  }
 0x197   : > { %v2178_v56 = vpop.trf.xlu0 }
 0x198   : > { %v2182_v50 = vunpack.i.h.bf16 %v2178_v56  ;;  %v2179_v7 = vunpack.i.l.bf16 %v2178_v56 }
 0x19b   : > { %v2183_v1 = vpop.trf.xlu0 }
 0x19c   : > { %v2187_v43 = vunpack.i.h.bf16 %v2183_v1  ;;  %v2184_v8 = vunpack.i.l.bf16 %v2183_v1 }
 0x19e   : > { %v651_v33 = vpack.c.bf16 %v2184_v8, %v2179_v7  ;;  %v659_v52 = vpack.c.bf16 %v2187_v43, %v2182_v50 }
 0x19f   : > { %v2188_v15 = vpop.trf.xlu0 }
 0x1a0   : > { %667 = vst [vmem:[#allocation2] sm:$0xff] %v651_v33  ;;  %675 = vst [vmem:[#allocation2 + $0x40] sm:$0xff] %v659_v52  ;;  %v2192_v16 = vunpack.i.h.bf16 %v2188_v15  ;;  %v2189_v11 = vunpack.i.l.bf16 %v2188_v15 }
 0x1a3   : > { %v2193_v12 = vpop.trf.xlu0 }
 0x1a4   : > { %v2197_v34 = vunpack.i.h.bf16 %v2193_v12  ;;  %v2194_v35 = vunpack.i.l.bf16 %v2193_v12 }
 0x1a6   : > { %v652_v36 = vpack.c.bf16 %v2194_v35, %v2189_v11  ;;  %v660_v38 = vpack.c.bf16 %v2197_v34, %v2192_v16 }
 0x1a7   : > { %v2198_v39 = vpop.trf.xlu0 }
 0x1a8   : > { %668 = vst [vmem:[#allocation2 + $0x8] sm:$0xff] %v652_v36  ;;  %676 = vst [vmem:[#allocation2 + $0x48] sm:$0xff] %v660_v38  ;;  %v2202_v40 = vunpack.i.h.bf16 %v2198_v39  ;;  %v2199_v42 = vunpack.i.l.bf16 %v2198_v39 }
 0x1ab   : > { %v2203_v44 = vpop.trf.xlu0 }
 0x1ac   : > { %v2207_v62 = vunpack.i.h.bf16 %v2203_v44  ;;  %v2204_v46 = vunpack.i.l.bf16 %v2203_v44 }
 0x1ae   : > { %v653_v2 = vpack.c.bf16 %v2204_v46, %v2199_v42  ;;  %v661_v48 = vpack.c.bf16 %v2207_v62, %v2202_v40 }
 0x1af   : > { %v2208_v23 = vpop.trf.xlu0 }
 0x1b0   : > { %669 = vst [vmem:[#allocation2 + $0x10] sm:$0xff] %v653_v2  ;;  %677 = vst [vmem:[#allocation2 + $0x50] sm:$0xff] %v661_v48  ;;  %v2212_v4 = vunpack.i.h.bf16 %v2208_v23  ;;  %v2209_v37 = vunpack.i.l.bf16 %v2208_v23 }
 0x1b3   : > { %v2213_v3 = vpop.trf.xlu0 }
 0x1b4   : > { %v2217_v58 = vunpack.i.h.bf16 %v2213_v3  ;;  %v2214_v51 = vunpack.i.l.bf16 %v2213_v3 }
 0x1b6   : > { %v654_v54 = vpack.c.bf16 %v2214_v51, %v2209_v37  ;;  %v662_v18 = vpack.c.bf16 %v2217_v58, %v2212_v4 }
 0x1b7   : > { %v2218_v53 = vpop.trf.xlu0 }
 0x1b8   : > { %670 = vst [vmem:[#allocation2 + $0x18] sm:$0xff] %v654_v54  ;;  %678 = vst [vmem:[#allocation2 + $0x58] sm:$0xff] %v662_v18  ;;  %v2222_v45 = vunpack.i.h.bf16 %v2218_v53  ;;  %v2219_v55 = vunpack.i.l.bf16 %v2218_v53 }
 0x1bb   : > { %v2223_v13 = vpop.trf.xlu0 }
 0x1bc   : > { %v2227_v14 = vunpack.i.h.bf16 %v2223_v13  ;;  %v2224_v57 = vunpack.i.l.bf16 %v2223_v13 }
 0x1be   : > { %v655_v59 = vpack.c.bf16 %v2224_v57, %v2219_v55  ;;  %v663_v61 = vpack.c.bf16 %v2227_v14, %v2222_v45 }
 0x1bf   : > { %v2228_v9 = vpop.trf.xlu0 }
 0x1c0   : > { %671 = vst [vmem:[#allocation2 + $0x20] sm:$0xff] %v655_v59  ;;  %679 = vst [vmem:[#allocation2 + $0x60] sm:$0xff] %v663_v61  ;;  %v2232_v63 = vunpack.i.h.bf16 %v2228_v9  ;;  %v2229_v10 = vunpack.i.l.bf16 %v2228_v9 }
 0x1c3   : > { %v2233_v19 = vpop.trf.xlu0 }
 0x1c4   : > { %v2237_v5 = vunpack.i.h.bf16 %v2233_v19  ;;  %v2234_v17 = vunpack.i.l.bf16 %v2233_v19 }
 0x1c6   : > { %v656_v21 = vpack.c.bf16 %v2234_v17, %v2229_v10  ;;  %v664_v6 = vpack.c.bf16 %v2237_v5, %v2232_v63 }
 0x1c7   : > { %v2238_v24 = vpop.trf.xlu0 }
 0x1c8   : > { %672 = vst [vmem:[#allocation2 + $0x28] sm:$0xff] %v656_v21  ;;  %680 = vst [vmem:[#allocation2 + $0x68] sm:$0xff] %v664_v6  ;;  %v2242_v25 = vunpack.i.h.bf16 %v2238_v24  ;;  %v2239_v27 = vunpack.i.l.bf16 %v2238_v24 }
 0x1cb   : > { %v2243_v28 = vpop.trf.xlu0 }
 0x1cc   : > { %v2247_v29 = vunpack.i.h.bf16 %v2243_v28  ;;  %v2244_v30 = vunpack.i.l.bf16 %v2243_v28 }
 0x1ce   : > { %v657_v20 = vpack.c.bf16 %v2244_v30, %v2239_v27  ;;  %v665_v31 = vpack.c.bf16 %v2247_v29, %v2242_v25 }
 0x1cf   : > { %v2248_v60 = vpop.trf.xlu0 }
 0x1d0   : > { %673 = vst [vmem:[#allocation2 + $0x30] sm:$0xff] %v657_v20  ;;  %681 = vst [vmem:[#allocation2 + $0x70] sm:$0xff] %v665_v31  ;;  %v2252_v22 = vunpack.i.h.bf16 %v2248_v60  ;;  %v2249_v32 = vunpack.i.l.bf16 %v2248_v60 }
 0x1d3   : > { %v2253_v0 = vpop.trf.xlu0 }
 0x1d4   : > { %v2257_v56 = vunpack.i.h.bf16 %v2253_v0  ;;  %v2254_v50 = vunpack.i.l.bf16 %v2253_v0 }
 0x1d6   : > { %v658_v7 = vpack.c.bf16 %v2254_v50, %v2249_v32  ;;  %v666_v1 = vpack.c.bf16 %v2257_v56, %v2252_v22 }
 0x1d8   : > { %674 = vst [vmem:[#allocation2 + $0x38] sm:$0xff] %v658_v7  ;;  %682 = vst [vmem:[#allocation2 + $0x78] sm:$0xff] %v666_v1 }
 0x1fb   : > { %v865_v43 = vpop.permute.xlu0 %864 }
 0x1fc   : > { %v1152_v8 = vadd.f32 %v2997_v47, %v865_v43  ;;  %v1154_v33 = vadd.f32 %v3000_v49, %v865_v43 }
 0x1fe   : > { %v1218_v52 = vpack.c.bf16 %v1152_v8, %v2992_v41  ;;  %v1219_v15 = vpack.c.bf16 %v1154_v33, %v2995_v26 }
 0x200   : > { %1250 = vst [vmem:[#allocation3 + $0xb0] sm:$0xff] %v1218_v52  ;;  %1251 = vst [vmem:[#allocation3 + $0xb8] sm:$0xff] %v1219_v15 }
 0x201 PF: > { %v1274_v16 = vld [vmem:[#allocation3 + $0x8] sm:$0xff]  ;;  %v1273_v11 = vld [vmem:[#allocation3] sm:$0xff]  ;;  %v1276_v12 = vld [vmem:[#allocation3 + $0x18] sm:$0xff]  ;;  %v2435_v34 = vmov 0   ;;  %s2045_s7 = sshll.u32 %s2416_s25, 7  ;;  %s1791_s11 = sld [smem:[#allocation4]] }
 0x202   : > { %1305 = vmatprep.subr.bf16.mxu0 %v1274_v16  ;;  %1337 = vmatprep.mubr.bf16.mxu0 %v2435_v34  ;;  %v1275_v35 = vld [vmem:[#allocation3 + $0x10] sm:$0xff]  ;;  %v1278_v47 = vld [vmem:[#allocation3 + $0x28] sm:$0xff]  ;;  %v1277_v41 = vld [vmem:[#allocation3 + $0x20] sm:$0xff]  ;;  %s1261_s23 = sshra.s32 %s2045_s7, 4  ;;  %s1771_s12 = sshra.s32 %s2045_s7, 7 }
 0x203   : > { %1306 = vmatpush1.bf16.msra.mxu0 %v1273_v11  ;;  %v1280_v49 = vld [vmem:[#allocation3 + $0x38] sm:$0xff]  ;;  %v1279_v26 = vld [vmem:[#allocation3 + $0x30] sm:$0xff]  ;;  %v1282_v36 = vld [vmem:[#allocation3 + $0x48] sm:$0xff]  ;;  %s2046_s8 = sshll.u32 %s1261_s23, 3  ;;  %s2047_s14 = sshll.u32 %s1771_s12, 3 }
 0x204   : > { %1307 = vmatprep.subr.bf16.mxu0 %v1276_v12  ;;  %v1281_v38 = vld [vmem:[#allocation3 + $0x40] sm:$0xff]  ;;  %v1284_v39 = vld [vmem:[#allocation3 + $0x58] sm:$0xff]  ;;  %v1283_v40 = vld [vmem:[#allocation3 + $0x50] sm:$0xff]  ;;  %s1264_s10 = scalar_lea.vmem [#allocation2], %s2046_s8  ;;  %s3300_s15 = scalar_lea.vmem %s2539_s20, %s2047_s14 }
 0x205   : > { %v1286_v42 = vld [vmem:[#allocation3 + $0x68] sm:$0xff]  ;;  %v1285_v44 = vld [vmem:[#allocation3 + $0x60] sm:$0xff]  ;;  %v1288_v62 = vld [vmem:[#allocation3 + $0x78] sm:$0xff]  ;;  %s2049_s20 = sshll.u32 (%p2520_p5), %s2420_s26, 5 }
 0x206   : > { %v1287_v46 = vld [vmem:[#allocation3 + $0x70] sm:$0xff]  ;;  %v1265_v2 = vld [vmem:[%s1264_s10] sm:$0xff]  ;;  %v1266_v48 = vld [vmem:[%s1264_s10 + $0x8] sm:$0xff]  ;;  %s1849_s9 = sadd.s32 (%p2520_p5), %s2416_s25, %s2049_s20 }
 0x207   : > { %1308 = vmatpush1.bf16.msra.mxu0 %v1275_v35  ;;  %v1267_v23 = vld [vmem:[%s1264_s10 + $0x10] sm:$0xff]  ;;  %v1268_v4 = vld [vmem:[%s1264_s10 + $0x18] sm:$0xff]  ;;  %v1269_v37 = vld [vmem:[%s1264_s10 + $0x20] sm:$0xff]  ;;  %s2050_s16 = sshll.u32 (%p2520_p5), %s1849_s9, 3 }
 0x208   : > { %1309 = vmatprep.subr.bf16.mxu0 %v1278_v47  ;;  %v1270_v3 = vld [vmem:[%s1264_s10 + $0x28] sm:$0xff]  ;;  %v1271_v58 = vld [vmem:[%s1264_s10 + $0x30] sm:$0xff]  ;;  %v1272_v51 = vld [vmem:[%s1264_s10 + $0x38] sm:$0xff]  ;;  %s1851_s19 = scalar_lea.vmem (%p2520_p5), %s3402_s6, %s2050_s16 }
 0x20b   : > { %1310 = vmatpush1.bf16.msra.mxu0 %v1277_v41 }
 0x20c   : > { %1311 = vmatprep.subr.bf16.mxu0 %v1280_v49 }
 0x20f   : > { %1312 = vmatpush1.bf16.msra.mxu0 %v1279_v26 }
 0x210   : > { %1313 = vmatprep.subr.bf16.mxu0 %v1282_v36 }
 0x213   : > { %1314 = vmatpush1.bf16.msra.mxu0 %v1281_v38 }
 0x214   : > { %1315 = vmatprep.subr.bf16.mxu0 %v1284_v39 }
 0x217   : > { %1316 = vmatpush1.bf16.msra.mxu0 %v1283_v40 }
 0x218   : > { %1317 = vmatprep.subr.bf16.mxu0 %v1286_v42 }
 0x21b   : > { %1318 = vmatpush1.bf16.msra.mxu0 %v1285_v44 }
 0x21c   : > { %1319 = vmatprep.subr.bf16.mxu0 %v1288_v62 }
 0x21f   : > { %1320 = vmatpush1.bf16.msra.mxu0 %v1287_v46 }
 0x222   : > { %1338 = vmatmul.mubr.bf16.vlgmr.msra.gmra.mrb[0].mxu0 %v1265_v2 }
 0x223   : > { %1347 = vmatprep.mubr.bf16.mxu0 %v2435_v34 }
 0x22a   : > { %1348 = vmatmul.mubr.bf16.gmra.mrb[4].mxu0 %v1266_v48 }
 0x22b   : > { %1357 = vmatprep.mubr.bf16.mxu0 %v2435_v34 }
 0x232   : > { %1358 = vmatmul.mubr.bf16.gmra.mrb[8].mxu0 %v1267_v23 }
 0x233   : > { %1367 = vmatprep.mubr.bf16.mxu0 %v2435_v34 }
 0x23a   : > { %1368 = vmatmul.mubr.bf16.gmra.mrb[12].mxu0 %v1268_v4 }
 0x23b   : > { %1377 = vmatprep.mubr.bf16.mxu0 %v2435_v34 }
 0x242   : > { %1378 = vmatmul.mubr.bf16.gmra.mrb[16].mxu0 %v1269_v37 }
 0x243   : > { %1387 = vmatprep.mubr.bf16.mxu0 %v2435_v34 }
 0x24a   : > { %1388 = vmatmul.mubr.bf16.gmra.mrb[20].mxu0 %v1270_v3 }
 0x24b   : > { %1397 = vmatprep.mubr.bf16.mxu0 %v2435_v34 }
 0x252   : > { %1398 = vmatmul.mubr.bf16.gmra.mrb[24].mxu0 %v1271_v58 }
 0x253   : > { %1407 = vmatprep.mubr.bf16.mxu0 %v2435_v34 }
 0x25a   : > { %1408 = vmatmul.mubr.bf16.gmra.mrb[28].mxu0 %v1272_v51 }
 0x2f5   : > { %v3041_v54 = vpop.f32.mrb[0].mxu0 }
 0x2f6   : > { %v3043_v18 = vpop.f32.mrb[1].mxu0 }
 0x2f7   : > { %v3045_v53 = vpop.f32.mrb[2].mxu0  ;;  %v1418_v45 = vmax.f32 %v3041_v54, %v3043_v18 }
 0x2f8   : > { %v3049_v55 = vpop.f32.mrb[3].mxu0 }
 0x2f9   : > { %1419 = vmax.xlane.f32.xlu0 %v1418_v45  ;;  %v1421_v13 = vmax.f32 %v3045_v53, %v3049_v55 }
 0x2fd   : > { %1422 = vmax.xlane.f32.xlu0 %v1421_v13  ;;  %v3053_v14 = vpop.f32.mrb[4].mxu0 }
 0x2fe   : > { %v3055_v57 = vpop.f32.mrb[5].mxu0 }
 0x2ff   : > { %v3057_v59 = vpop.f32.mrb[6].mxu0  ;;  %v1424_v61 = vmax.f32 %v3053_v14, %v3055_v57 }
 0x300   : > { %v3061_v9 = vpop.f32.mrb[7].mxu0 }
 0x301   : > { %1425 = vmax.xlane.f32.xlu1 %v1424_v61  ;;  %v1427_v63 = vmax.f32 %v3057_v59, %v3061_v9 }
 0x305   : > { %1428 = vmax.xlane.f32.xlu1 %v1427_v63  ;;  %v3065_v10 = vpop.f32.mrb[8].mxu0 }
 0x306   : > { %v3067_v19 = vpop.f32.mrb[9].mxu0 }
 0x307   : > { %v3069_v5 = vpop.f32.mrb[10].mxu0  ;;  %v1430_v17 = vmax.f32 %v3065_v10, %v3067_v19 }
 0x308   : > { %v3073_v21 = vpop.f32.mrb[11].mxu0 }
 0x309   : > { %1431 = vmax.xlane.f32.xlu0 %v1430_v17  ;;  %v1433_v6 = vmax.f32 %v3069_v5, %v3073_v21 }
 0x30b   : > { %1434 = vmax.xlane.f32.xlu1 %v1433_v6 }
 0x30d   : > { %v3077_v24 = vpop.f32.mrb[12].mxu0 }
 0x30e   : > { %v3079_v25 = vpop.f32.mrb[13].mxu0 }
 0x30f   : > { %v3081_v27 = vpop.f32.mrb[14].mxu0  ;;  %v1436_v28 = vmax.f32 %v3077_v24, %v3079_v25 }
 0x310   : > { %v3085_v29 = vpop.f32.mrb[15].mxu0 }
 0x311   : > { %1437 = vmax.xlane.f32.xlu0 %v1436_v28  ;;  %v1439_v30 = vmax.f32 %v3081_v27, %v3085_v29 }
 0x313   : > { %1440 = vmax.xlane.f32.xlu1 %v1439_v30 }
 0x315   : > { %v3089_v20 = vpop.f32.mrb[16].mxu0 }
 0x316   : > { %v3091_v31 = vpop.f32.mrb[17].mxu0 }
 0x317   : > { %v3093_v60 = vpop.f32.mrb[18].mxu0  ;;  %v1442_v22 = vmax.f32 %v3089_v20, %v3091_v31 }
 0x318   : > { %v3097_v32 = vpop.f32.mrb[19].mxu0 }
 0x319   : > { %1443 = vmax.xlane.f32.xlu0 %v1442_v22  ;;  %v1445_v0 = vmax.f32 %v3093_v60, %v3097_v32 }
 0x31b   : > { %1446 = vmax.xlane.f32.xlu1 %v1445_v0 }
 0x31d   : > { %v3101_v56 = vpop.f32.mrb[20].mxu0 }
 0x31e   : > { %v3103_v50 = vpop.f32.mrb[21].mxu0 }
 0x31f   : > { %v3105_v7 = vpop.f32.mrb[22].mxu0  ;;  %v1448_v1 = vmax.f32 %v3101_v56, %v3103_v50 }
 0x320   : > { %v3109_v43 = vpop.f32.mrb[23].mxu0 }
 0x321   : > { %1449 = vmax.xlane.f32.xlu0 %v1448_v1  ;;  %v1451_v8 = vmax.f32 %v3105_v7, %v3109_v43 }
 0x323   : > { %1452 = vmax.xlane.f32.xlu1 %v1451_v8 }
 0x325   : > { %v3113_v33 = vpop.f32.mrb[24].mxu0 }
 0x326   : > { %v3115_v52 = vpop.f32.mrb[25].mxu0 }
 0x327   : > { %v3117_v15 = vpop.f32.mrb[26].mxu0  ;;  %v1454_v16 = vmax.f32 %v3113_v33, %v3115_v52 }
 0x328   : > { %v3121_v11 = vpop.f32.mrb[27].mxu0 }
 0x329   : > { %1455 = vmax.xlane.f32.xlu0 %v1454_v16  ;;  %v1457_v12 = vmax.f32 %v3117_v15, %v3121_v11 }
 0x32b   : > { %1458 = vmax.xlane.f32.xlu1 %v1457_v12 }
 0x32d   : > { %v3125_v34 = vpop.f32.mrb[28].mxu0 }
 0x32e   : > { %v3127_v35 = vpop.f32.mrb[29].mxu0 }
 0x32f   : > { %v3129_v47 = vpop.f32.mrb[30].mxu0  ;;  %v1460_v41 = vmax.f32 %v3125_v34, %v3127_v35 }
 0x330   : > { %v3133_v49 = vpop.f32.mrb[31].mxu0 }
 0x331   : > { %1461 = vmax.xlane.f32.xlu0 %v1460_v41  ;;  %v1463_v26 = vmax.f32 %v3129_v47, %v3133_v49 }
 0x333   : > { %1464 = vmax.xlane.f32.xlu1 %v1463_v26 }
 0x386   : > { %v1420_v36 = vpop.xlane.xlu0 %1419 }
 0x387   : > { %v1466_v38 = vsub.f32 %v3041_v54, %v1420_v36  ;;  %v1467_v39 = vsub.f32 %v3043_v18, %v1420_v36 }
 0x389   : > { %v1498_v40 = vmul.f32 1.442695, %v1466_v38  ;;  %v1500_v42 = vmul.f32 1.442695, %v1467_v39 }
 0x38a   : > { %v1423_v44 = vpop.xlane.xlu0 %1422 }
 0x38b   : > { %2282 = vpow2.f32 %v1498_v40  ;;  %v1468_v62 = vsub.f32 %v3045_v53, %v1423_v44  ;;  %v1469_v46 = vsub.f32 %v3049_v55, %v1423_v44 }
 0x38c   : > { %2284 = vpow2.f32 %v1500_v42 }
 0x38d   : > { %v1502_v2 = vmul.f32 1.442695, %v1468_v62  ;;  %v1504_v48 = vmul.f32 1.442695, %v1469_v46 }
 0x38e   : > { %v1426_v23 = vpop.xlane.xlu1 %1425 }
 0x38f   : > { %2286 = vpow2.f32 %v1502_v2  ;;  %v1470_v4 = vsub.f32 %v3053_v14, %v1426_v23  ;;  %v1471_v37 = vsub.f32 %v3055_v57, %v1426_v23 }
 0x390   : > { %2288 = vpow2.f32 %v1504_v48 }
 0x391   : > { %v1506_v3 = vmul.f32 1.442695, %v1470_v4  ;;  %v1508_v58 = vmul.f32 1.442695, %v1471_v37 }
 0x392   : > { %v1429_v51 = vpop.xlane.xlu1 %1428 }
 0x393   : > { %2290 = vpow2.f32 %v1506_v3  ;;  %v1472_v54 = vsub.f32 %v3057_v59, %v1429_v51  ;;  %v1473_v18 = vsub.f32 %v3061_v9, %v1429_v51 }
 0x394   : > { %2292 = vpow2.f32 %v1508_v58 }
 0x395   : > { %v3145_v53 = vpop.eup %2282  ;;  %v1510_v45 = vmul.f32 1.442695, %v1472_v54  ;;  %v1512_v55 = vmul.f32 1.442695, %v1473_v18 }
 0x396   : > { %v3147_v13 = vpop.eup %2284  ;;  %v1432_v61 = vpop.xlane.xlu0 %1431 }
 0x397   : > { %2294 = vpow2.f32 %v1510_v45  ;;  %v1474_v14 = vsub.f32 %v3065_v10, %v1432_v61  ;;  %v1475_v57 = vsub.f32 %v3067_v19, %v1432_v61  ;;  %v1562_v63 = vadd.f32 %v3147_v13, %v3145_v53 }
 0x398   : > { %2296 = vpow2.f32 %v1512_v55  ;;  %v1435_v59 = vpop.xlane.xlu1 %1434 }
 0x399   : > { %v3153_v17 = vpop.eup %2286  ;;  %v1514_v9 = vmul.f32 1.442695, %v1474_v14  ;;  %v1516_v6 = vmul.f32 1.442695, %v1475_v57  ;;  %v1476_v28 = vsub.f32 %v3069_v5, %v1435_v59  ;;  %v1477_v30 = vsub.f32 %v3073_v21, %v1435_v59  ;;  %1563 = vadd.xlane.f32.xlu0 %v1562_v63 }
 0x39a   : > { %v3157_v22 = vpop.eup %2288 }
 0x39b   : > { %2298 = vpow2.f32 %v1514_v9  ;;  %v1518_v10 = vmul.f32 1.442695, %v1476_v28  ;;  %v1520_v0 = vmul.f32 1.442695, %v1477_v30  ;;  %v1565_v19 = vadd.f32 %v3157_v22, %v3153_v17 }
 0x39c   : > { %2300 = vpow2.f32 %v1516_v6 }
 0x39d   : > { %v3161_v1 = vpop.eup %2290  ;;  %2302 = vpow2.f32 %v1518_v10  ;;  %1566 = vadd.xlane.f32.xlu1 %v1565_v19 }
 0x39e   : > { %v3163_v8 = vpop.eup %2292  ;;  %2304 = vpow2.f32 %v1520_v0  ;;  %v1438_v5 = vpop.xlane.xlu0 %1437 }
 0x39f   : > { %v1478_v21 = vsub.f32 %v3077_v24, %v1438_v5  ;;  %v1479_v16 = vsub.f32 %v3079_v25, %v1438_v5  ;;  %v1568_v12 = vadd.f32 %v3163_v8, %v3161_v1 }
 0x3a0   : > { %v1441_v41 = vpop.xlane.xlu1 %1440 }
 0x3a1   : > { %v3169_v26 = vpop.eup %2294  ;;  %v1522_v36 = vmul.f32 1.442695, %v1478_v21  ;;  %v1524_v38 = vmul.f32 1.442695, %v1479_v16  ;;  %v1480_v39 = vsub.f32 %v3081_v27, %v1441_v41  ;;  %v1481_v40 = vsub.f32 %v3085_v29, %v1441_v41  ;;  %1569 = vadd.xlane.f32.xlu0 %v1568_v12 }
 0x3a2   : > { %v3173_v42 = vpop.eup %2296 }
 0x3a3   : > { %2306 = vpow2.f32 %v1522_v36  ;;  %v1526_v44 = vmul.f32 1.442695, %v1480_v39  ;;  %v1528_v24 = vmul.f32 1.442695, %v1481_v40  ;;  %v1571_v25 = vadd.f32 %v3173_v42, %v3169_v26 }
 0x3a4   : > { %2308 = vpow2.f32 %v1524_v38 }
 0x3a5   : > { %v3177_v62 = vpop.eup %2298  ;;  %2310 = vpow2.f32 %v1526_v44  ;;  %1572 = vadd.xlane.f32.xlu1 %v1571_v25 }
 0x3a6   : > { %v3179_v46 = vpop.eup %2300  ;;  %2312 = vpow2.f32 %v1528_v24  ;;  %v1444_v27 = vpop.xlane.xlu0 %1443 }
 0x3a7   : > { %v3181_v2 = vpop.eup %2302  ;;  %v1482_v29 = vsub.f32 %v3089_v20, %v1444_v27  ;;  %v1483_v48 = vsub.f32 %v3091_v31, %v1444_v27  ;;  %v1574_v23 = vadd.f32 %v3179_v46, %v3177_v62 }
 0x3a8   : > { %v3187_v4 = vpop.eup %2304  ;;  %v1447_v37 = vpop.xlane.xlu1 %1446 }
 0x3a9   : > { %v1530_v3 = vmul.f32 1.442695, %v1482_v29  ;;  %v1532_v58 = vmul.f32 1.442695, %v1483_v48  ;;  %v1484_v51 = vsub.f32 %v3093_v60, %v1447_v37  ;;  %v1485_v54 = vsub.f32 %v3097_v32, %v1447_v37  ;;  %1575 = vadd.xlane.f32.xlu0 %v1574_v23 }
 0x3aa   : > { %v1577_v18 = vadd.f32 %v3187_v4, %v3181_v2 }
 0x3ab   : > { %2314 = vpow2.f32 %v1530_v3  ;;  %v1534_v20 = vmul.f32 1.442695, %v1484_v51  ;;  %v1536_v45 = vmul.f32 1.442695, %v1485_v54 }
 0x3ac   : > { %2316 = vpow2.f32 %v1532_v58  ;;  %1578 = vadd.xlane.f32.xlu1 %v1577_v18 }
 0x3ad   : > { %v3193_v31 = vpop.eup %2306  ;;  %2318 = vpow2.f32 %v1534_v20 }
 0x3ae   : > { %v3195_v55 = vpop.eup %2308  ;;  %2320 = vpow2.f32 %v1536_v45  ;;  %v1450_v61 = vpop.xlane.xlu0 %1449 }
 0x3af   : > { %v3197_v14 = vpop.eup %2310  ;;  %v1486_v60 = vsub.f32 %v3101_v56, %v1450_v61  ;;  %v1487_v32 = vsub.f32 %v3103_v50, %v1450_v61  ;;  %v1580_v57 = vadd.f32 %v3195_v55, %v3193_v31 }
 0x3b0   : > { %v3203_v63 = vpop.eup %2312  ;;  %v1453_v59 = vpop.xlane.xlu1 %1452 }
 0x3b1   : > { %v1538_v9 = vmul.f32 1.442695, %v1486_v60  ;;  %v1540_v6 = vmul.f32 1.442695, %v1487_v32  ;;  %v1488_v28 = vsub.f32 %v3105_v7, %v1453_v59  ;;  %v1489_v30 = vsub.f32 %v3109_v43, %v1453_v59  ;;  %1581 = vadd.xlane.f32.xlu0 %v1580_v57 }
 0x3b2   : > { %v1583_v10 = vadd.f32 %v3203_v63, %v3197_v14 }
 0x3b3   : > { %2322 = vpow2.f32 %v1538_v9  ;;  %v1542_v56 = vmul.f32 1.442695, %v1488_v28  ;;  %v1544_v0 = vmul.f32 1.442695, %v1489_v30  ;;  %v1294_v30 = vld [vmem:[#allocation3 + $0xa8] sm:$0xff] }
 0x3b4   : > { %2324 = vpow2.f32 %v1540_v6  ;;  %1584 = vadd.xlane.f32.xlu1 %v1583_v10  ;;  %1722 = vmatprep.mubr.bf16.mxu1 %v1294_v30  ;;  %v1290_v10 = vld [vmem:[#allocation3 + $0x88] sm:$0xff] }
 0x3b5   : > { %v3209_v50 = vpop.eup %2314  ;;  %2326 = vpow2.f32 %v1542_v56  ;;  %1706 = vmatprep.mubr.bf16.mxu0 %v1290_v10 }
 0x3b6   : > { %v3211_v19 = vpop.eup %2316  ;;  %2328 = vpow2.f32 %v1544_v0  ;;  %v1456_v5 = vpop.xlane.xlu0 %1455 }
 0x3b7   : > { %v3213_v21 = vpop.eup %2318  ;;  %v1490_v7 = vsub.f32 %v3113_v33, %v1456_v5  ;;  %v1491_v43 = vsub.f32 %v3115_v52, %v1456_v5  ;;  %v1586_v16 = vadd.f32 %v3211_v19, %v3209_v50 }
 0x3b8   : > { %v3219_v12 = vpop.eup %2320  ;;  %v1459_v41 = vpop.xlane.xlu1 %1458 }
 0x3b9   : > { %v1546_v36 = vmul.f32 1.442695, %v1490_v7  ;;  %v1548_v38 = vmul.f32 1.442695, %v1491_v43  ;;  %v1492_v39 = vsub.f32 %v3117_v15, %v1459_v41  ;;  %v1493_v40 = vsub.f32 %v3121_v11, %v1459_v41  ;;  %1587 = vadd.xlane.f32.xlu0 %v1586_v16 }
 0x3ba   : > { %v1589_v44 = vadd.f32 %v3219_v12, %v3213_v21 }
 0x3bb   : > { %2330 = vpow2.f32 %v1546_v36  ;;  %v1550_v33 = vmul.f32 1.442695, %v1492_v39  ;;  %v1552_v24 = vmul.f32 1.442695, %v1493_v40 }
 0x3bc   : > { %2332 = vpow2.f32 %v1548_v38  ;;  %1590 = vadd.xlane.f32.xlu1 %v1589_v44 }
 0x3bd   : > { %v3225_v52 = vpop.eup %2322  ;;  %2334 = vpow2.f32 %v1550_v33 }
 0x3be   : > { %v3227_v25 = vpop.eup %2324  ;;  %2336 = vpow2.f32 %v1552_v24  ;;  %v1462_v27 = vpop.xlane.xlu0 %1461 }
 0x3bf   : > { %v3229_v29 = vpop.eup %2326  ;;  %v1494_v15 = vsub.f32 %v3125_v34, %v1462_v27  ;;  %v1495_v11 = vsub.f32 %v3127_v35, %v1462_v27  ;;  %v1592_v48 = vadd.f32 %v3227_v25, %v3225_v52 }
 0x3c0   : > { %v3235_v23 = vpop.eup %2328  ;;  %v1465_v37 = vpop.xlane.xlu1 %1464 }
 0x3c1   : > { %v1554_v3 = vmul.f32 1.442695, %v1494_v15  ;;  %v1556_v58 = vmul.f32 1.442695, %v1495_v11  ;;  %1593 = vadd.xlane.f32.xlu0 %v1592_v48  ;;  %v1496_v51 = vsub.f32 %v3129_v47, %v1465_v37  ;;  %v1497_v54 = vsub.f32 %v3133_v49, %v1465_v37 }
 0x3c2   : > { %v1595_v18 = vadd.f32 %v3235_v23, %v3229_v29 }
 0x3c3   : > { %2338 = vpow2.f32 %v1554_v3  ;;  %v1558_v34 = vmul.f32 1.442695, %v1496_v51  ;;  %v1560_v20 = vmul.f32 1.442695, %v1497_v54 }
 0x3c4   : > { %2340 = vpow2.f32 %v1556_v58  ;;  %1596 = vadd.xlane.f32.xlu1 %v1595_v18 }
 0x3c5   : > { %v3241_v35 = vpop.eup %2330  ;;  %2342 = vpow2.f32 %v1558_v34 }
 0x3c6   : > { %v3243_v45 = vpop.eup %2332  ;;  %2344 = vpow2.f32 %v1560_v20 }
 0x3c7   : > { %v3245_v61 = vpop.eup %2334  ;;  %v1598_v47 = vadd.f32 %v3243_v45, %v3241_v35 }
 0x3c8   : > { %v3249_v49 = vpop.eup %2336 }
 0x3c9   : > { %1599 = vadd.xlane.f32.xlu0 %v1598_v47  ;;  %v1601_v60 = vadd.f32 %v3249_v49, %v3245_v61 }
 0x3cb   : > { %1602 = vadd.xlane.f32.xlu1 %v1601_v60 }
 0x3cd   : > { %v3253_v32 = vpop.eup %2338 }
 0x3ce   : > { %v3255_v57 = vpop.eup %2340 }
 0x3cf   : > { %v3257_v59 = vpop.eup %2342  ;;  %v1604_v9 = vadd.f32 %v3255_v57, %v3253_v32 }
 0x3d0   : > { %v3261_v6 = vpop.eup %2344 }
 0x3d1   : > { %1605 = vadd.xlane.f32.xlu0 %v1604_v9  ;;  %v1607_v28 = vadd.f32 %v3261_v6, %v3257_v59 }
 0x3d3   : > { %1608 = vadd.xlane.f32.xlu1 %v1607_v28 }
 0x426   : > { %v1564_v56 = vpop.xlane.xlu0 %1563 }
 0x427   : > { %2346 = vrcp.f32 %v1564_v56 }
 0x42a   : > { %v1567_v0 = vpop.xlane.xlu1 %1566 }
 0x42b   : > { %2348 = vrcp.f32 %v1567_v0 }
 0x42e   : > { %v1570_v5 = vpop.xlane.xlu0 %1569 }
 0x42f   : > { %2350 = vrcp.f32 %v1570_v5 }
 0x431   : > { %v2347_v43 = vpop.eup %2346 }
 0x432   : > { %v1573_v7 = vpop.xlane.xlu1 %1572  ;;  %v1627_v36 = vmul.f32 %v2347_v43, %v3147_v13  ;;  %v1626_v39 = vmul.f32 %v2347_v43, %v3145_v53 }
 0x433   : > { %2352 = vrcp.f32 %v1573_v7 }
 0x435   : > { %v2349_v16 = vpop.eup %2348 }
 0x436   : > { %v1576_v41 = vpop.xlane.xlu0 %1575  ;;  %v1629_v38 = vmul.f32 %v2349_v16, %v3157_v22  ;;  %v1628_v40 = vmul.f32 %v2349_v16, %v3153_v17 }
 0x437   : > { %2354 = vrcp.f32 %v1576_v41 }
 0x438   : > { %v1659_v44 = vpack.c.bf16 %v1629_v38, %v1627_v36  ;;  %v1658_v33 = vpack.c.bf16 %v1628_v40, %v1626_v39 }
 0x439   : > { %v1579_v24 = vpop.xlane.xlu1 %1578  ;;  %v2351_v27 = vpop.eup %2350 }
 0x43a   : > { %2356 = vrcp.f32 %v1579_v24  ;;  %1674 = vmatprep.subr.bf16.mxu0 %v1659_v44  ;;  %2070 = vmatprep.subr.bf16.mxu1 %v1659_v44  ;;  %v1631_v13 = vmul.f32 %v2351_v27, %v3163_v8  ;;  %v1630_v53 = vmul.f32 %v2351_v27, %v3161_v1 }
 0x43b   : > { %1675 = vmatpush1.bf16.xpose.msra.mxu0 %v1658_v33  ;;  %2078 = vmatpush1.bf16.xpose.msra.mxu1 %v1658_v33 }
 0x43d   : > { %v2353_v15 = vpop.eup %2352 }
 0x43e   : > { %v1582_v11 = vpop.xlane.xlu0 %1581  ;;  %v1633_v22 = vmul.f32 %v2353_v15, %v3173_v42  ;;  %v1632_v17 = vmul.f32 %v2353_v15, %v3169_v26 }
 0x43f   : > { %2358 = vrcp.f32 %v1582_v11 }
 0x440   : > { %v1661_v48 = vpack.c.bf16 %v1633_v22, %v1631_v13  ;;  %v1660_v37 = vpack.c.bf16 %v1632_v17, %v1630_v53 }
 0x441   : > { %v1585_v3 = vpop.xlane.xlu1 %1584  ;;  %v2355_v58 = vpop.eup %2354 }
 0x442   : > { %2360 = vrcp.f32 %v1585_v3  ;;  %1676 = vmatprep.subr.bf16.mxu0 %v1661_v48  ;;  %2071 = vmatprep.subr.bf16.mxu1 %v1661_v48  ;;  %v1635_v54 = vmul.f32 %v2355_v58, %v3179_v46  ;;  %v1634_v26 = vmul.f32 %v2355_v58, %v3177_v62  ;;  %v1289_v48 = vld [vmem:[#allocation3 + $0x80] sm:$0xff]  ;;  %v1292_v3 = vld [vmem:[#allocation3 + $0x98] sm:$0xff]  ;;  %v1298_v58 = vld [vmem:[#allocation3 + $0xc8] sm:$0xff] }
 0x443   : > { %1677 = vmatpush1.bf16.xpose.msra.mxu0 %v1660_v37  ;;  %2079 = vmatpush1.bf16.xpose.msra.mxu1 %v1660_v37  ;;  %v1296_v37 = vld [vmem:[#allocation3 + $0xb8] sm:$0xff] }
 0x444   : > { %v2357_v51 = vpop.eup %2356 }
 0x445   : > { %v1637_v8 = vmul.f32 %v2357_v51, %v3187_v4  ;;  %v1636_v42 = vmul.f32 %v2357_v51, %v3181_v2  ;;  %v1299_v51 = vld [vmem:[#allocation3 + $0xd0] sm:$0xff] }
 0x446   : > { %v1588_v1 = vpop.xlane.xlu0 %1587 }
 0x447   : > { %v1663_v18 = vpack.c.bf16 %v1637_v8, %v1635_v54  ;;  %2362 = vrcp.f32 %v1588_v1  ;;  %v1662_v20 = vpack.c.bf16 %v1636_v42, %v1634_v26  ;;  %v1302_v54 = vld [vmem:[#allocation3 + $0xe8] sm:$0xff]  ;;  %v1301_v8 = vld [vmem:[#allocation3 + $0xe0] sm:$0xff]  ;;  %v1304_v42 = vld [vmem:[#allocation3 + $0xf8] sm:$0xff] }
 0x448   : > { %v1303_v1 = vld [vmem:[#allocation3 + $0xf0] sm:$0xff] }
 0x449   : > { %1678 = vmatprep.subr.bf16.mxu0 %v1663_v18  ;;  %2072 = vmatprep.subr.bf16.mxu1 %v1663_v18  ;;  %v1591_v34 = vpop.xlane.xlu1 %1590  ;;  %v2359_v47 = vpop.eup %2358  ;;  %v3302_v18 = vstv %s1791_s11 }
 0x44a   : > { %2364 = vrcp.f32 %v1591_v34  ;;  %v1639_v46 = vmul.f32 %v2359_v47, %v3195_v55  ;;  %v1638_v62 = vmul.f32 %v2359_v47, %v3193_v31  ;;  %v1779_v34 = vld [vmem:[%s3300_s15 + $0x40] sm:$0xff] }
 0x44b   : > { %1679 = vmatpush1.bf16.xpose.msra.mxu0 %v1662_v20  ;;  %2080 = vmatpush1.bf16.xpose.msra.mxu1 %v1662_v20  ;;  %v1775_v47 = vld [vmem:[%s3300_s15] sm:$0xff] }
 0x44c   : > { %v2361_v60 = vpop.eup %2360 }
 0x44d   : > { %v1641_v4 = vmul.f32 %v2361_v60, %v3203_v63  ;;  %v1640_v2 = vmul.f32 %v2361_v60, %v3197_v14 }
 0x44e   : > { %v1594_v9 = vpop.xlane.xlu0 %1593 }
 0x44f   : > { %v1665_v28 = vpack.c.bf16 %v1641_v4, %v1639_v46  ;;  %2366 = vrcp.f32 %v1594_v9  ;;  %v1664_v10 = vpack.c.bf16 %v1640_v2, %v1638_v62 }
 0x451   : > { %1680 = vmatprep.subr.bf16.mxu0 %v1665_v28  ;;  %2073 = vmatprep.subr.bf16.mxu1 %v1665_v28  ;;  %v1597_v30 = vpop.xlane.xlu1 %1596  ;;  %v2363_v56 = vpop.eup %2362  ;;  %v1780_v28 = vld [vmem:[%s3300_s15 + $0x50] sm:$0xff] }
 0x452   : > { %2368 = vrcp.f32 %v1597_v30  ;;  %v1643_v55 = vmul.f32 %v2363_v56, %v3211_v19  ;;  %v1642_v31 = vmul.f32 %v2363_v56, %v3209_v50  ;;  %v1776_v30 = vld [vmem:[%s3300_s15 + $0x10] sm:$0xff] }
 0x453   : > { %1681 = vmatpush1.bf16.xpose.msra.mxu0 %v1664_v10  ;;  %2081 = vmatpush1.bf16.xpose.msra.mxu1 %v1664_v10 }
 0x454   : > { %v2365_v0 = vpop.eup %2364 }
 0x455   : > { %v1645_v63 = vmul.f32 %v2365_v0, %v3219_v12  ;;  %v1644_v14 = vmul.f32 %v2365_v0, %v3213_v21 }
 0x456   : > { %v1600_v5 = vpop.xlane.xlu0 %1599 }
 0x457   : > { %2370 = vrcp.f32 %v1600_v5  ;;  %v1667_v7 = vpack.c.bf16 %v1645_v63, %v1643_v55  ;;  %v1666_v16 = vpack.c.bf16 %v1644_v14, %v1642_v31 }
 0x458   : > { %v1603_v43 = vpop.xlane.xlu1 %1602 }
 0x459   : > { %1682 = vmatprep.subr.bf16.mxu0 %v1667_v7  ;;  %2074 = vmatprep.subr.bf16.mxu1 %v1667_v7  ;;  %2372 = vrcp.f32 %v1603_v43  ;;  %v2367_v41 = vpop.eup %2366  ;;  %v1781_v43 = vld [vmem:[%s3300_s15 + $0x60] sm:$0xff] }
 0x45a   : > { %v1647_v19 = vmul.f32 %v2367_v41, %v3227_v25  ;;  %v1646_v50 = vmul.f32 %v2367_v41, %v3225_v52  ;;  %v1777_v41 = vld [vmem:[%s3300_s15 + $0x20] sm:$0xff] }
 0x45b   : > { %1683 = vmatpush1.bf16.xpose.msra.mxu0 %v1666_v16  ;;  %2082 = vmatpush1.bf16.xpose.msra.mxu1 %v1666_v16 }
 0x45c   : > { %v2369_v36 = vpop.eup %2368 }
 0x45d   : > { %v1649_v12 = vmul.f32 %v2369_v36, %v3235_v23  ;;  %v1648_v21 = vmul.f32 %v2369_v36, %v3229_v29 }
 0x45e   : > { %v1606_v38 = vpop.xlane.xlu0 %1605 }
 0x45f   : > { %2374 = vrcp.f32 %v1606_v38  ;;  %v1669_v39 = vpack.c.bf16 %v1649_v12, %v1647_v19  ;;  %v1668_v33 = vpack.c.bf16 %v1648_v21, %v1646_v50 }
 0x460   : > { %v1609_v40 = vpop.xlane.xlu1 %1608 }
 0x461   : > { %v2371_v44 = vpop.eup %2370  ;;  %1684 = vmatprep.subr.bf16.mxu0 %v1669_v39  ;;  %2075 = vmatprep.subr.bf16.mxu1 %v1669_v39  ;;  %2376 = vrcp.f32 %v1609_v40  ;;  %v1782_v39 = vld [vmem:[%s3300_s15 + $0x70] sm:$0xff] }
 0x462   : > { %v1651_v25 = vmul.f32 %v2371_v44, %v3243_v45  ;;  %v1650_v15 = vmul.f32 %v2371_v44, %v3241_v35  ;;  %v1293_v35 = vld [vmem:[#allocation3 + $0xa0] sm:$0xff]  ;;  %v1778_v40 = vld [vmem:[%s3300_s15 + $0x30] sm:$0xff] }
 0x463   : > { %v2373_v24 = vpop.eup %2372  ;;  %1685 = vmatpush1.bf16.xpose.msra.mxu0 %v1668_v33  ;;  %2083 = vmatpush1.bf16.xpose.msra.mxu1 %v1668_v33 }
 0x464   : > { %v1653_v23 = vmul.f32 %v2373_v24, %v3249_v49  ;;  %v1652_v29 = vmul.f32 %v2373_v24, %v3245_v61 }
 0x466   : > { %v1671_v27 = vpack.c.bf16 %v1653_v23, %v1651_v25  ;;  %v1670_v11 = vpack.c.bf16 %v1652_v29, %v1650_v15 }
 0x468   : > { %1686 = vmatprep.subr.bf16.mxu0 %v1671_v27  ;;  %2076 = vmatprep.subr.bf16.mxu1 %v1671_v27 }
 0x469   : > { %v2375_v52 = vpop.eup %2374 }
 0x46a   : > { %v1655_v22 = vmul.f32 %v2375_v52, %v3255_v57  ;;  %v1654_v49 = vmul.f32 %v2375_v52, %v3253_v32  ;;  %v1295_v57 = vld [vmem:[#allocation3 + $0xb0] sm:$0xff]  ;;  %v1297_v32 = vld [vmem:[#allocation3 + $0xc0] sm:$0xff] }
 0x46b   : > { %v2377_v13 = vpop.eup %2376  ;;  %1687 = vmatpush1.bf16.xpose.msra.mxu0 %v1670_v11  ;;  %2084 = vmatpush1.bf16.xpose.msra.mxu1 %v1670_v11  ;;  %v1783_v11 = vld [vmem:[%s3300_s15 + $0x80] sm:$0xff] }
 0x46c   : > { %v1657_v53 = vmul.f32 %v2377_v13, %v3261_v6  ;;  %v1656_v45 = vmul.f32 %v2377_v13, %v3257_v59  ;;  %v1291_v6 = vld [vmem:[#allocation3 + $0x90] sm:$0xff]  ;;  %v1300_v59 = vld [vmem:[#allocation3 + $0xd8] sm:$0xff] }
 0x46e   : > { %v1673_v17 = vpack.c.bf16 %v1657_v53, %v1655_v22  ;;  %v1672_v61 = vpack.c.bf16 %v1656_v45, %v1654_v49  ;;  %v1784_v45 = vld [vmem:[%s3300_s15 + $0x90] sm:$0xff] }
 0x470   : > { %1688 = vmatprep.subr.bf16.mxu0 %v1673_v17  ;;  %2077 = vmatprep.subr.bf16.mxu1 %v1673_v17 }
 0x473   : > { %1689 = vmatpush1.bf16.xpose.msra.mxu0 %v1672_v61  ;;  %2085 = vmatpush1.bf16.xpose.msra.mxu1 %v1672_v61 }
 0x47a   : > { %1723 = vmatmul.mubr.bf16.vlgmr.msra.gmra.mrb[0].mxu1 %v1293_v35  ;;  %1707 = vmatmul.mubr.bf16.vlgmr.msra.gmra.mrb[32].mxu0 %v1289_v48 }
 0x47b   : > { %1730 = vmatprep.mubr.bf16.mxu1 %v1296_v37  ;;  %1714 = vmatprep.mubr.bf16.mxu0 %v1292_v3  ;;  %v1785_v37 = vld [vmem:[%s3300_s15 + $0xa0] sm:$0xff] }
 0x482   : > { %1731 = vmatmul.mubr.bf16.gmra.mrb[4].mxu1 %v1295_v57  ;;  %1715 = vmatmul.mubr.bf16.gmra.mrb[36].mxu0 %v1291_v6 }
 0x483   : > { %1738 = vmatprep.mubr.bf16.mxu1 %v1298_v58  ;;  %v1786_v58 = vld [vmem:[%s3300_s15 + $0xb0] sm:$0xff] }
 0x48a   : > { %1739 = vmatmul.mubr.bf16.gmra.mrb[8].mxu1 %v1297_v32 }
 0x48b   : > { %1746 = vmatprep.mubr.bf16.mxu1 %v1300_v59 }
 0x492   : > { %1747 = vmatmul.mubr.bf16.gmra.mrb[12].mxu1 %v1299_v51 }
 0x493   : > { %1754 = vmatprep.mubr.bf16.mxu1 %v1302_v54 }
 0x49a   : > { %1755 = vmatmul.mubr.bf16.gmra.mrb[16].mxu1 %v1301_v8 }
 0x49b   : > { %1762 = vmatprep.mubr.bf16.mxu1 %v1304_v42  ;;  %v1787_v42 = vld [vmem:[%s3300_s15 + $0xc0] sm:$0xff] }
 0x4a2   : > { %1763 = vmatmul.mubr.bf16.gmra.mrb[20].mxu1 %v1303_v1 }
 0x54d   : > { %v1724_v26 = vpop.f32.mrb[0].mxu1  ;;  %v1708_v20 = vpop.f32.mrb[32].mxu0 }
 0x54e   : > { %v1797_v60 = vmul.f32 %v3302_v18, %v1724_v26  ;;  %v1726_v46 = vpop.f32.mrb[1].mxu1  ;;  %v1793_v4 = vmul.f32 %v3302_v18, %v1708_v20  ;;  %v1710_v2 = vpop.f32.mrb[33].mxu0  ;;  %v1788_v20 = vld [vmem:[%s3300_s15 + $0xd0] sm:$0xff] }
 0x54f   : > { %v1727_v9 = vpop.f32.mrb[2].mxu1  ;;  %v1711_v62 = vpop.f32.mrb[34].mxu0 }
 0x550   : > { %v1813_v10 = vadd.f32 %v1797_v60, %v1779_v34  ;;  %v1798_v56 = vmul.f32 %v3302_v18, %v1727_v9  ;;  %v1729_v0 = vpop.f32.mrb[3].mxu1  ;;  %v1809_v55 = vadd.f32 %v1793_v4, %v1775_v47  ;;  %v1794_v63 = vmul.f32 %v3302_v18, %v1711_v62  ;;  %v1713_v14 = vpop.f32.mrb[35].mxu0  ;;  %v1789_v9 = vld [vmem:[%s3300_s15 + $0xe0] sm:$0xff] }
 0x552   : > { %1829 = vst [vmem:[%s2541_s21 + $0x20] sm:$0xff] %v1813_v10  ;;  %v1814_v5 = vadd.f32 %v1798_v56, %v1780_v28  ;;  %1825 = vst [vmem:[%s2541_s21] sm:$0xff] %v1809_v55  ;;  %v1810_v7 = vadd.f32 %v1794_v63, %v1776_v30  ;;  %v1790_v10 = vld [vmem:[%s3300_s15 + $0xf0] sm:$0xff] }
 0x554   : > { %1830 = vst [vmem:[%s2541_s21 + $0x28] sm:$0xff] %v1814_v5  ;;  %1826 = vst [vmem:[%s2541_s21 + $0x8] sm:$0xff] %v1810_v7 }
 0x555   : > { %v1732_v31 = vpop.f32.mrb[4].mxu1  ;;  %v1716_v16 = vpop.f32.mrb[36].mxu0 }
 0x556   : > { %v1799_v36 = vmul.f32 %v3302_v18, %v1732_v31  ;;  %v1734_v19 = vpop.f32.mrb[5].mxu1  ;;  %v1795_v12 = vmul.f32 %v3302_v18, %v1716_v16  ;;  %v1718_v21 = vpop.f32.mrb[37].mxu0 }
 0x557   : > { %v1735_v38 = vpop.f32.mrb[6].mxu1  ;;  %v1719_v50 = vpop.f32.mrb[38].mxu0 }
 0x558   : > { %v1815_v44 = vadd.f32 %v1799_v36, %v1781_v43  ;;  %v1800_v33 = vmul.f32 %v3302_v18, %v1735_v38  ;;  %v1737_v24 = vpop.f32.mrb[7].mxu1  ;;  %v1811_v25 = vadd.f32 %v1795_v12, %v1777_v41  ;;  %v1796_v23 = vmul.f32 %v3302_v18, %v1719_v50  ;;  %v1721_v29 = vpop.f32.mrb[39].mxu0 }
 0x559   : > { %v1917_v31 = vld [vmem:[%s2541_s21 + $0x20] sm:$0xff] (%p2520_p5) }
 0x55a   : > { %1831 = vst [vmem:[%s2541_s21 + $0x30] sm:$0xff] %v1815_v44  ;;  %v1816_v27 = vadd.f32 %v1800_v33, %v1782_v39  ;;  %1827 = vst [vmem:[%s2541_s21 + $0x10] sm:$0xff] %v1811_v25  ;;  %v1812_v15 = vadd.f32 %v1796_v23, %v1778_v40 }
 0x55b   : > { %v1911_v14 = vld [vmem:[%s2541_s21 + $0x8] sm:$0xff] (%p2520_p5)  ;;  %1918 = vst [vmem:[%s1851_s19 + $0x40] sm:$0xff] (%p2520_p5), %v1917_v31 }
 0x55c   : > { %1832 = vst [vmem:[%s2541_s21 + $0x38] sm:$0xff] %v1816_v27  ;;  %1828 = vst [vmem:[%s2541_s21 + $0x18] sm:$0xff] %v1812_v15  ;;  %v1919_v43 = vld [vmem:[%s2541_s21 + $0x28] sm:$0xff] (%p2520_p5) }
 0x55d   : > { %v1740_v52 = vpop.f32.mrb[8].mxu1  ;;  %1912 = vst [vmem:[%s1851_s19 + $0x10] sm:$0xff] (%p2520_p5), %v1911_v14  ;;  %1920 = vst [vmem:[%s1851_s19 + $0x50] sm:$0xff] (%p2520_p5), %v1919_v43 }
 0x55e   : > { %v1801_v13 = vmul.f32 %v3302_v18, %v1740_v52  ;;  %v1742_v22 = vpop.f32.mrb[9].mxu1 }
 0x55f   : > { %v1743_v53 = vpop.f32.mrb[10].mxu1 }
 0x560   : > { %v1817_v17 = vadd.f32 %v1801_v13, %v1783_v11  ;;  %v1802_v49 = vmul.f32 %v3302_v18, %v1743_v53  ;;  %v1745_v61 = vpop.f32.mrb[11].mxu1 }
 0x561   : > { %v1913_v5 = vld [vmem:[%s2541_s21 + $0x10] sm:$0xff] (%p2520_p5) }
 0x562   : > { %1833 = vst [vmem:[%s2541_s21 + $0x40] sm:$0xff] %v1817_v17  ;;  %v1818_v35 = vadd.f32 %v1802_v49, %v1784_v45  ;;  %v1921_v16 = vld [vmem:[%s2541_s21 + $0x30] sm:$0xff] (%p2520_p5)  ;;  %1914 = vst [vmem:[%s1851_s19 + $0x20] sm:$0xff] (%p2520_p5), %v1913_v5 }
 0x563   : > { %v1915_v7 = vld [vmem:[%s2541_s21 + $0x18] sm:$0xff] (%p2520_p5)  ;;  %1922 = vst [vmem:[%s1851_s19 + $0x60] sm:$0xff] (%p2520_p5), %v1921_v16 }
 0x564   : > { %1834 = vst [vmem:[%s2541_s21 + $0x48] sm:$0xff] %v1818_v35  ;;  %v1923_v41 = vld [vmem:[%s2541_s21 + $0x38] sm:$0xff] (%p2520_p5)  ;;  %1916 = vst [vmem:[%s1851_s19 + $0x30] sm:$0xff] (%p2520_p5), %v1915_v7 }
 0x565   : > { %v1748_v48 = vpop.f32.mrb[12].mxu1  ;;  %1924 = vst [vmem:[%s1851_s19 + $0x70] sm:$0xff] (%p2520_p5), %v1923_v41 }
 0x566   : > { %v1803_v3 = vmul.f32 %v3302_v18, %v1748_v48  ;;  %v1750_v57 = vpop.f32.mrb[13].mxu1 }
 0x567   : > { %v1751_v6 = vpop.f32.mrb[14].mxu1 }
 0x568   : > { %v1819_v32 = vadd.f32 %v1803_v3, %v1785_v37  ;;  %v1804_v59 = vmul.f32 %v3302_v18, %v1751_v6  ;;  %v1753_v51 = vpop.f32.mrb[15].mxu1 }
 0x569   : > { %v1925_v36 = vld [vmem:[%s2541_s21 + $0x40] sm:$0xff] (%p2520_p5) }
 0x56a   : > { %1835 = vst [vmem:[%s2541_s21 + $0x50] sm:$0xff] %v1819_v32  ;;  %v1820_v54 = vadd.f32 %v1804_v59, %v1786_v58  ;;  %1926 = vst [vmem:[%s1851_s19 + $0x80] sm:$0xff] (%p2520_p5), %v1925_v36 }
 0x56b   : > { %v1927_v19 = vld [vmem:[%s2541_s21 + $0x48] sm:$0xff] (%p2520_p5) }
 0x56c   : > { %1836 = vst [vmem:[%s2541_s21 + $0x58] sm:$0xff] %v1820_v54  ;;  %1928 = vst [vmem:[%s1851_s19 + $0x90] sm:$0xff] (%p2520_p5), %v1927_v19 }
 0x56d   : > { %v1756_v8 = vpop.f32.mrb[16].mxu1 }
 0x56e   : > { %v1805_v1 = vmul.f32 %v3302_v18, %v1756_v8  ;;  %v1758_v26 = vpop.f32.mrb[17].mxu1 }
 0x56f   : > { %v1759_v34 = vpop.f32.mrb[18].mxu1 }
 0x570   : > { %v1821_v47 = vadd.f32 %v1805_v1, %v1787_v42  ;;  %v1806_v60 = vmul.f32 %v3302_v18, %v1759_v34  ;;  %v1761_v46 = vpop.f32.mrb[19].mxu1 }
 0x571   : > { %v1929_v12 = vld [vmem:[%s2541_s21 + $0x50] sm:$0xff] (%p2520_p5) }
 0x572   : > { %1837 = vst [vmem:[%s2541_s21 + $0x60] sm:$0xff] %v1821_v47  ;;  %v1822_v4 = vadd.f32 %v1806_v60, %v1788_v20  ;;  %1930 = vst [vmem:[%s1851_s19 + $0xa0] sm:$0xff] (%p2520_p5), %v1929_v12 }
 0x573   : > { %v1931_v21 = vld [vmem:[%s2541_s21 + $0x58] sm:$0xff] (%p2520_p5) }
 0x574   : > { %1838 = vst [vmem:[%s2541_s21 + $0x68] sm:$0xff] %v1822_v4  ;;  %1932 = vst [vmem:[%s1851_s19 + $0xb0] sm:$0xff] (%p2520_p5), %v1931_v21 }
 0x575   : > { %v1764_v2 = vpop.f32.mrb[20].mxu1 }
 0x576   : > { %v1807_v28 = vmul.f32 %v3302_v18, %v1764_v2  ;;  %v1766_v62 = vpop.f32.mrb[21].mxu1  ;;  %1847 = sbr.rel (!%p2520_p5) target bundleno = 1413 (0x585), region = 52 }
 0x577   : > { %v1767_v30 = vpop.f32.mrb[22].mxu1 }
 0x578   : > { %v1823_v56 = vadd.f32 %v1807_v28, %v1789_v9  ;;  %v1808_v0 = vmul.f32 %v3302_v18, %v1767_v30  ;;  %v1769_v55 = vpop.f32.mrb[23].mxu1  ;;  %v1909_v18 = vld [vmem:[%s2541_s21] sm:$0xff] (%p2520_p5) }
 0x579   : > { %1910 = vst [vmem:[%s1851_s19] sm:$0xff] (%p2520_p5), %v1909_v18  ;;  %v1933_v38 = vld [vmem:[%s2541_s21 + $0x60] sm:$0xff] (%p2520_p5) }
 0x57a   : > { %1839 = vst [vmem:[%s2541_s21 + $0x70] sm:$0xff] %v1823_v56  ;;  %v1824_v63 = vadd.f32 %v1808_v0, %v1790_v10  ;;  %1934 = vst [vmem:[%s1851_s19 + $0xc0] sm:$0xff] (%p2520_p5), %v1933_v38 }
 0x57b   : > { %v1935_v39 = vld [vmem:[%s2541_s21 + $0x68] sm:$0xff] (%p2520_p5) }
 0x57c   : > { %1840 = vst [vmem:[%s2541_s21 + $0x78] sm:$0xff] %v1824_v63  ;;  %1936 = vst [vmem:[%s1851_s19 + $0xd0] sm:$0xff] (%p2520_p5), %v1935_v39 }
 0x581   : > { %v1937_v50 = vld [vmem:[%s2541_s21 + $0x70] sm:$0xff] }
 0x582   : > { %1938 = vst [vmem:[%s1851_s19 + $0xe0] sm:$0xff] %v1937_v50 }
 0x583   : > { %v1939_v40 = vld [vmem:[%s2541_s21 + $0x78] sm:$0xff] }
 0x584   : > { %1940 = vst [vmem:[%s1851_s19 + $0xf0] sm:$0xff] %v1939_v40 }
 0x585 PF: > { %s17_s29 = sadd.s32 1, %s2432_s29   ;;  %s3404_s23 = smov %s2412_s24 }
 0x586   : > { %p14_p11 = scmp.ge.s32.totalorder %s17_s29, 6   ;;  %s3405_s24 = smov %s2531_s13 }
 0x587   : > { %s3406_s25 = smov %s2424_s27  ;;  %s3407_s26 = smov %s2428_s28 }
 0x588   : > { %s3408_s27 = smov %s3411_s5  ;;  %s3409_s28 = smov %s3415_s30 }
 0x589   :  { %16 = sbr.rel (!%p14_p11) target bundleno = 6 (0x6), region = 118 }

</bundles_post_ra>
